<compile_context>
chip_gen: v5e
topology: v5e:2x2
jax: 0.10.0
libtpu: 0.0.40
codegen_flags: <defaults>
</compile_context>

<pallas_src>
import functools

import jax
import jax.numpy as jnp
from jax import lax
from jax.experimental import pallas as pl
from jax.experimental.pallas import tpu as pltpu

# ----- config (small synthetic sizes consistent with the module) -----
D_MODEL = 32
NHEAD = 4
HEAD_DIM = D_MODEL // NHEAD
DIM_FF = 64
LN_EPS = 1e-5

PACKED_ORDER = [
    "sWqkv", "sbqkv", "sWo", "sbo",              # self-attention (QKV fused, scale folded)
    "cWq", "cbq", "cWkv", "cbkv", "cWo", "cbo",  # cross-attention (KV fused)
    "ln1", "ln2", "ln3",                         # LayerNorms: rows = (gamma, beta)
    "w1", "b1", "w2", "b2",                      # feed-forward
]


# ----- shared math (works on kernel Refs and on plain arrays for the reference) -----
def _matmul(x, w, cdt):
    """MXU matmul with bf16 (or f32) operands and f32 accumulation."""
    return jnp.dot(x.astype(cdt), w.astype(cdt), preferred_element_type=jnp.float32)


def _layernorm(x, ln):
    lnv = ln[...]                       # (2, C): row 0 = gamma, row 1 = beta
    g, b = lnv[0:1, :], lnv[1:2, :]
    mu = jnp.mean(x, axis=-1, keepdims=True)
    xc = x - mu
    var = jnp.mean(xc * xc, axis=-1, keepdims=True)
    return xc * lax.rsqrt(var + LN_EPS) * g + b


def _mha(q_proj, q_off, kv_proj, k_off, v_off, nb, lq, lk, wo, bo, recip, cdt):
    """Multi-head attention core. q_proj: (nb*lq, *), kv_proj: (nb*lk, *) already
    projected (1/sqrt(Dh) folded into the Q projection). Batch handled by 3-D
    single-batch-dim einsums; per-head context vectors are concatenated along lanes
    and fed to ONE (C, C) output projection. Returns (nb*lq, C) in f32."""
    heads = []
    for h in range(NHEAD):
        qs, ks, vs = q_off + h * HEAD_DIM, k_off + h * HEAD_DIM, v_off + h * HEAD_DIM
        qh = q_proj[:, qs:qs + HEAD_DIM].reshape(nb, lq, HEAD_DIM).astype(cdt)
        kh = kv_proj[:, ks:ks + HEAD_DIM].reshape(nb, lk, HEAD_DIM).astype(cdt)
        vh = kv_proj[:, vs:vs + HEAD_DIM].reshape(nb, lk, HEAD_DIM).astype(cdt)
        s = jnp.einsum("bqd,bkd->bqk", qh, kh, preferred_element_type=jnp.float32)
        s = s - jnp.max(s, axis=-1, keepdims=True)
        p = jnp.exp(s)
        p = p * recip(jnp.sum(p, axis=-1, keepdims=True))
        oh = jnp.einsum("bqk,bkd->bqd", p.astype(cdt), vh,
                        preferred_element_type=jnp.float32)
        heads.append(oh.reshape(nb * lq, HEAD_DIM))
    ctx = jnp.concatenate(heads, axis=-1)                  # (nb*lq, C)
    return _matmul(ctx, wo[...], cdt) + bo[...]


def _layer_math(x2d, kx2d, nb, lq, lk, prm, *, recip, cdt):
    """Full decoder layer (forward_post, eval). x2d: (nb*lq, C), kx2d: (nb*lk, C)."""
    C = D_MODEL
    # ---- self-attention: one fused QKV projection (1/sqrt(Dh) pre-folded into Wq/bq) ----
    qkv = _matmul(x2d, prm["sWqkv"][...], cdt) + prm["sbqkv"][...]
    sa = _mha(qkv, 0, qkv, C, 2 * C, nb, lq, lq, prm["sWo"], prm["sbo"], recip, cdt)
    q = _layernorm(x2d + sa, prm["ln1"])
    # ---- cross-attention: query = `query2` (raw self-attn output), as in forward_post.
    # TODO(synk): MS_Attention source not provided (sr_ratio multi-scale branch,
    # key_pos / opt_ms_input / xyz_upsample geometry); implemented as standard
    # multi-head cross attention over `key`.
    cq = _matmul(sa, prm["cWq"][...], cdt) + prm["cbq"][...]
    ckv = _matmul(kx2d, prm["cWkv"][...], cdt) + prm["cbkv"][...]
    ca = _mha(cq, 0, ckv, 0, C, nb, lq, lk, prm["cWo"], prm["cbo"], recip, cdt)
    q = _layernorm(q + ca, prm["ln2"])
    # ---- feed-forward (relu; dropout = identity in eval) ----
    h = jnp.maximum(_matmul(q, prm["w1"][...], cdt) + prm["b1"][...], 0.0)
    ffn = _matmul(h, prm["w2"][...], cdt) + prm["b2"][...]
    return _layernorm(q + ffn, prm["ln3"])


# ----- Pallas kernel: whole layer fused in VMEM, batch folded into the block -----
def _make_kernel(nb, lq, lk):
    def kernel(*refs):
        x_ref, k_ref = refs[0], refs[1]
        o_ref = refs[-1]
        prm = dict(zip(PACKED_ORDER, refs[2:-1]))   # Refs: weights read at point of use
        out = _layer_math(x_ref[...], k_ref[...], nb, lq, lk, prm,
                          recip=lambda d: pl.reciprocal(d, approx=True),
                          cdt=jnp.bfloat16)
        o_ref[...] = out.astype(o_ref.dtype)
    return kernel


@functools.partial(jax.jit, static_argnames=("num_blocks",))
def _forward(query, key, packed, *, num_blocks=1):
    B, C, Pq = query.shape
    Pk = key.shape[2]
    assert C == D_MODEL and B % num_blocks == 0
    nb = B // num_blocks

    # (B, C, P) -> (B*P, C): tokens on sublanes, channels on lanes (fused under jit).
    x2d = jnp.transpose(query, (0, 2, 1)).reshape(B * Pq, C)
    k2d = jnp.transpose(key, (0, 2, 1)).reshape(B * Pk, C)
    param_list = [packed[name] for name in PACKED_ORDER]

    in_specs = [
        pl.BlockSpec((nb * Pq, C), lambda g: (g, 0)),
        pl.BlockSpec((nb * Pk, C), lambda g: (g, 0)),
    ] + [pl.BlockSpec(p.shape, lambda g: (0, 0)) for p in param_list]

    # advisory cost estimate (helps XLA schedule the surrounding layout ops)
    H, Dh, F = NHEAD, HEAD_DIM, DIM_FF
    flops = 2 * B * (Pq * C * 3 * C + Pq * C * C             # self qkv + out proj
                     + H * Pq * Pq * Dh * 2                  # self scores + pv
                     + Pq * C * C + Pk * C * 2 * C + Pq * C * C   # cross q / kv / out
                     + H * Pq * Pk * Dh * 2                  # cross scores + pv
                     + Pq * C * F * 2)                       # ffn
    trans = B * H * (Pq * Pq + Pq * Pk) + 3 * B * Pq
    pbytes = sum(int(p.size) * p.dtype.itemsize for p in param_list)
    bytes_accessed = 4 * (x2d.size + k2d.size + B * Pq * C) + pbytes

    out2d = pl.pallas_call(
        _make_kernel(nb, Pq, Pk),
        out_shape=jax.ShapeDtypeStruct((B * Pq, C), jnp.float32),
        grid=(num_blocks,),
        in_specs=in_specs,
        out_specs=pl.BlockSpec((nb * Pq, C), lambda g: (g, 0)),
        compiler_params=pltpu.CompilerParams(dimension_semantics=("parallel",)),
        cost_estimate=pl.CostEstimate(flops=int(flops), transcendentals=int(trans),
                                      bytes_accessed=int(bytes_accessed)),
    )(x2d, k2d, *param_list)

    return jnp.transpose(out2d.reshape(B, Pq, C), (0, 2, 1))


def ms_transformer_decoder_layer(query, key, query_pos, key_pos, packed,
                                 opt_ms_input=None, xyz_upsample=None, *, num_blocks=1):
    """query: (B, C, Pq), key: (B, C, Pk) -> (B, C, Pq), like forward_post.
    query_pos/key_pos/opt_ms_input/xyz_upsample accepted for interface parity only
    (posembed=None; MS_Attention geometry branch not implemented).
    num_blocks: grid size over batch groups. 1 = fully fused single step (best at small
    sizes); 2 on v7x (requires B % 2 == 0) shards over both TensorCores.
    TODO(synk): for long sequences (Pq*Pk*4B near VMEM, esp. v7x's 64 MiB) add a
    Pk-tiled online-softmax inner loop."""
    del query_pos, key_pos, opt_ms_input, xyz_upsample
    return _forward(query, key, packed, num_blocks=num_blocks)


# ----- deterministic synthetic parameters -----
def init_raw_params(rng):
    C, F = D_MODEL, DIM_FF
    shapes = {
        "sWq": (C, C), "sWk": (C, C), "sWv": (C, C),
        "sbq": (1, C), "sbk": (1, C), "sbv": (1, C),
        "sWo": (C, C), "sbo": (1, C),
        "cWq": (C, C), "cWk": (C, C), "cWv": (C, C),
        "cbq": (1, C), "cbk": (1, C), "cbv": (1, C),
        "cWo": (C, C), "cbo": (1, C),
        "w1": (C, F), "b1": (1, F),
        "w2": (F, C), "b2": (1, C),
    }
    raw = {}
    keys = jax.random.split(rng, len(shapes))
    for k, (name, shp) in zip(keys, shapes.items()):
        scale = 0.05 if shp[0] > 1 else 0.01
        raw[name] = scale * jax.random.normal(k, shp, jnp.float32)
    for i in (1, 2, 3):
        raw[f"ln{i}g"] = jnp.ones((1, C), jnp.float32)
        raw[f"ln{i}b"] = jnp.zeros((1, C), jnp.float32)
    return raw


def pack_params(raw, use_bf16=True):
    """Fuse QKV / KV projections, fold 1/sqrt(head_dim) into the Q projection, fuse
    LayerNorm gamma/beta into (2, C), and cast the weight matrices to bf16 (MXU
    operands). Weights are (in, out); to load real nn.MultiheadAttention weights,
    split in_proj_weight (3C, C) into three (C, C) rows and transpose first."""
    wdt = jnp.bfloat16 if use_bf16 else jnp.float32
    scale = 1.0 / (HEAD_DIM ** 0.5)
    p = {
        "sWqkv": jnp.concatenate([raw["sWq"] * scale, raw["sWk"], raw["sWv"]],
                                 axis=1).astype(wdt),
        "sbqkv": jnp.concatenate([raw["sbq"] * scale, raw["sbk"], raw["sbv"]], axis=1),
        "sWo": raw["sWo"].astype(wdt),
        "sbo": raw["sbo"],
        "cWq": (raw["cWq"] * scale).astype(wdt),
        "cbq": raw["cbq"] * scale,
        "cWkv": jnp.concatenate([raw["cWk"], raw["cWv"]], axis=1).astype(wdt),
        "cbkv": jnp.concatenate([raw["cbk"], raw["cbv"]], axis=1),
        "cWo": raw["cWo"].astype(wdt),
        "cbo": raw["cbo"],
        "w1": raw["w1"].astype(wdt), "b1": raw["b1"],
        "w2": raw["w2"].astype(wdt), "b2": raw["b2"],
    }
    for i in (1, 2, 3):
        p[f"ln{i}"] = jnp.concatenate([raw[f"ln{i}g"], raw[f"ln{i}b"]], axis=0)
    return p


# ----- pure-JAX reference (identical math, whole batch at once) -----
def reference(query, key, packed, *, cdt):
    B, C, Pq = query.shape
    Pk = key.shape[2]
    x2d = jnp.transpose(query, (0, 2, 1)).reshape(B * Pq, C)
    k2d = jnp.transpose(key, (0, 2, 1)).reshape(B * Pk, C)
    out = _layer_math(x2d, k2d, B, Pq, Pk, packed,
                      recip=lambda d: 1.0 / d, cdt=cdt)
    return jnp.transpose(out.reshape(B, Pq, C), (0, 2, 1))


if __name__ == "__main__":
    B, Pq, Pk = 2, 8, 16
    root = jax.random.PRNGKey(0)
    kq, kk, kqp, kkp, kp = jax.random.split(root, 5)
    query = jax.random.normal(kq, (B, D_MODEL, Pq), jnp.float32)      # B C Pq
    key_feat = jax.random.normal(kk, (B, D_MODEL, Pk), jnp.float32)   # B C Pk
    query_pos = jax.random.normal(kqp, (B, Pq, 3), jnp.float32)       # B Pq 3
    key_pos = jax.random.normal(kkp, (B, Pk, 3), jnp.float32)         # B Pk 3
    raw = init_raw_params(kp)

    packed = pack_params(raw, use_bf16=True)
    out = ms_transformer_decoder_layer(query, key_feat, query_pos, key_pos, packed,
                                       opt_ms_input=None, xyz_upsample=None,
                                       num_blocks=1)
    out = jax.block_until_ready(out)
    assert out.shape == (B, D_MODEL, Pq), out.shape

    # 1) tight check against the identical (bf16-operand) math in plain JAX
    ref_bf16 = reference(query, key_feat, packed, cdt=jnp.bfloat16)
    err = float(jnp.max(jnp.abs(out - ref_bf16)))
    assert jnp.allclose(out, ref_bf16, atol=5e-3, rtol=5e-3), f"bf16 ref mismatch {err}"

    # 2) semantic check against the full-f32 math (bf16 policy differs only by rounding)
    ref_f32 = reference(query, key_feat, pack_params(raw, use_bf16=False),
                        cdt=jnp.float32)
    err32 = float(jnp.max(jnp.abs(out - ref_f32)))
    assert jnp.allclose(out, ref_f32, atol=5e-2, rtol=5e-2), f"f32 ref mismatch {err32}"

    print("KERNEL_OK")
</pallas_src>

<mosaic_0001>
module attributes {stable_mosaic.version = 11 : i64} {
  func.func @kernel(%arg0: i32, %arg1: memref<16x32xf32, #tpu.memory_space<vmem>>, %arg2: memref<32x32xf32, #tpu.memory_space<vmem>>, %arg3: memref<32x96xbf16, #tpu.memory_space<vmem>>, %arg4: memref<1x96xf32, #tpu.memory_space<vmem>>, %arg5: memref<32x32xbf16, #tpu.memory_space<vmem>>, %arg6: memref<1x32xf32, #tpu.memory_space<vmem>>, %arg7: memref<32x32xbf16, #tpu.memory_space<vmem>>, %arg8: memref<1x32xf32, #tpu.memory_space<vmem>>, %arg9: memref<32x64xbf16, #tpu.memory_space<vmem>>, %arg10: memref<1x64xf32, #tpu.memory_space<vmem>>, %arg11: memref<32x32xbf16, #tpu.memory_space<vmem>>, %arg12: memref<1x32xf32, #tpu.memory_space<vmem>>, %arg13: memref<2x32xf32, #tpu.memory_space<vmem>>, %arg14: memref<2x32xf32, #tpu.memory_space<vmem>>, %arg15: memref<2x32xf32, #tpu.memory_space<vmem>>, %arg16: memref<32x64xbf16, #tpu.memory_space<vmem>>, %arg17: memref<1x64xf32, #tpu.memory_space<vmem>>, %arg18: memref<64x32xbf16, #tpu.memory_space<vmem>>, %arg19: memref<1x32xf32, #tpu.memory_space<vmem>>, %arg20: memref<16x32xf32, #tpu.memory_space<vmem>>) attributes {dimension_semantics = [#tpu.dimension_semantics<parallel>], iteration_bounds = array<i64: 1>, scalar_prefetch = 0 : i64, scratch_operands = 0 : i64, tpu.core_type = #tpu.core_type<tc>, window_params = [{transform_indices = @transform_0, window_bounds = array<i64: 16, 32>}, {transform_indices = @transform_1, window_bounds = array<i64: 32, 32>}, {pipeline_mode = #tpu.pipeline_mode<synchronous>, transform_indices = @transform_2, window_bounds = array<i64: 32, 96>}, {pipeline_mode = #tpu.pipeline_mode<synchronous>, transform_indices = @transform_3, window_bounds = array<i64: 1, 96>}, {pipeline_mode = #tpu.pipeline_mode<synchronous>, transform_indices = @transform_4, window_bounds = array<i64: 32, 32>}, {pipeline_mode = #tpu.pipeline_mode<synchronous>, transform_indices = @transform_5, window_bounds = array<i64: 1, 32>}, {pipeline_mode = #tpu.pipeline_mode<synchronous>, transform_indices = @transform_6, window_bounds = array<i64: 32, 32>}, {pipeline_mode = #tpu.pipeline_mode<synchronous>, transform_indices = @transform_7, window_bounds = array<i64: 1, 32>}, {pipeline_mode = #tpu.pipeline_mode<synchronous>, transform_indices = @transform_8, window_bounds = array<i64: 32, 64>}, {pipeline_mode = #tpu.pipeline_mode<synchronous>, transform_indices = @transform_9, window_bounds = array<i64: 1, 64>}, {pipeline_mode = #tpu.pipeline_mode<synchronous>, transform_indices = @transform_10, window_bounds = array<i64: 32, 32>}, {pipeline_mode = #tpu.pipeline_mode<synchronous>, transform_indices = @transform_11, window_bounds = array<i64: 1, 32>}, {pipeline_mode = #tpu.pipeline_mode<synchronous>, transform_indices = @transform_12, window_bounds = array<i64: 2, 32>}, {pipeline_mode = #tpu.pipeline_mode<synchronous>, transform_indices = @transform_13, window_bounds = array<i64: 2, 32>}, {pipeline_mode = #tpu.pipeline_mode<synchronous>, transform_indices = @transform_14, window_bounds = array<i64: 2, 32>}, {pipeline_mode = #tpu.pipeline_mode<synchronous>, transform_indices = @transform_15, window_bounds = array<i64: 32, 64>}, {pipeline_mode = #tpu.pipeline_mode<synchronous>, transform_indices = @transform_16, window_bounds = array<i64: 1, 64>}, {pipeline_mode = #tpu.pipeline_mode<synchronous>, transform_indices = @transform_17, window_bounds = array<i64: 64, 32>}, {pipeline_mode = #tpu.pipeline_mode<synchronous>, transform_indices = @transform_18, window_bounds = array<i64: 1, 32>}, {transform_indices = @transform_19, window_bounds = array<i64: 16, 32>}]} {
    %c0 = arith.constant 0 : index
    %c0_0 = arith.constant 0 : index
    %0 = vector.load %arg1[%c0, %c0_0] : memref<16x32xf32, #tpu.memory_space<vmem>>, vector<16x32xf32>
    %c0_1 = arith.constant 0 : index
    %c0_2 = arith.constant 0 : index
    %1 = vector.load %arg2[%c0_1, %c0_2] : memref<32x32xf32, #tpu.memory_space<vmem>>, vector<32x32xf32>
    %c0_3 = arith.constant 0 : index
    %c0_4 = arith.constant 0 : index
    %2 = vector.load %arg3[%c0_3, %c0_4] : memref<32x96xbf16, #tpu.memory_space<vmem>>, vector<32x96xbf16>
    %3 = arith.truncf %0 : vector<16x32xf32> to vector<16x32xbf16>
    %cst = arith.constant dense<0.000000e+00> : vector<16x96xf32>
    %4 = tpu.matmul %3, %2, %cst {dimension_numbers = #tpu.dot_dimension_numbers<[1], [0], [0], [1], [0, 0, 1, 1], [], []>} : vector<16x32xbf16>, vector<32x96xbf16>, vector<16x96xf32> -> vector<16x96xf32>
    %c0_5 = arith.constant 0 : index
    %c0_6 = arith.constant 0 : index
    %5 = vector.load %arg4[%c0_5, %c0_6] : memref<1x96xf32, #tpu.memory_space<vmem>>, vector<1x96xf32>
    %6 = vector.broadcast %5 : vector<1x96xf32> to vector<16x96xf32>
    %7 = arith.addf %4, %6 : vector<16x96xf32>
    %8 = vector.extract_strided_slice %7 {offsets = [0, 0], sizes = [16, 8], strides = [1, 1]} : vector<16x96xf32> to vector<16x8xf32>
    %9 = vector.shape_cast %8 : vector<16x8xf32> to vector<2x8x8xf32>
    %10 = arith.truncf %9 : vector<2x8x8xf32> to vector<2x8x8xbf16>
    %11 = vector.extract_strided_slice %7 {offsets = [0, 32], sizes = [16, 8], strides = [1, 1]} : vector<16x96xf32> to vector<16x8xf32>
    %12 = vector.shape_cast %11 : vector<16x8xf32> to vector<2x8x8xf32>
    %13 = arith.truncf %12 : vector<2x8x8xf32> to vector<2x8x8xbf16>
    %14 = vector.extract_strided_slice %7 {offsets = [0, 64], sizes = [16, 8], strides = [1, 1]} : vector<16x96xf32> to vector<16x8xf32>
    %15 = vector.shape_cast %14 : vector<16x8xf32> to vector<2x8x8xf32>
    %16 = arith.truncf %15 : vector<2x8x8xf32> to vector<2x8x8xbf16>
    "tpu.trace_start"() <{level = 10 : i32, message = "bqd,bkd->bqk"}> : () -> ()
    %cst_7 = arith.constant dense<0.000000e+00> : vector<2x8x8xf32>
    %17 = tpu.matmul %10, %13, %cst_7 {dimension_numbers = #tpu.dot_dimension_numbers<[2], [2], [1], [1], [0, 0, 0, 1, 1, 1], [0], [0]>} : vector<2x8x8xbf16>, vector<2x8x8xbf16>, vector<2x8x8xf32> -> vector<2x8x8xf32>
    "tpu.trace_stop"() : () -> ()
    %cst_8 = arith.constant dense<0xFF800000> : vector<2x8xf32>
    %18 = vector.multi_reduction <maximumf>, %17, %cst_8 [2] : vector<2x8x8xf32> to vector<2x8xf32>
    %19 = vector.shape_cast %18 : vector<2x8xf32> to vector<2x8x1xf32>
    %20 = vector.broadcast %19 : vector<2x8x1xf32> to vector<2x8x8xf32>
    %21 = arith.subf %17, %20 : vector<2x8x8xf32>
    %22 = math.exp %21 : vector<2x8x8xf32>
    %cst_9 = arith.constant dense<0.000000e+00> : vector<2x8xf32>
    %23 = vector.multi_reduction <add>, %22, %cst_9 [2] : vector<2x8x8xf32> to vector<2x8xf32>
    %24 = vector.shape_cast %23 : vector<2x8xf32> to vector<2x8x1xf32>
    %25 = tpu.reciprocal %24 {approx = true} : vector<2x8x1xf32> -> vector<2x8x1xf32>
    %26 = vector.broadcast %25 : vector<2x8x1xf32> to vector<2x8x8xf32>
    %27 = arith.mulf %22, %26 : vector<2x8x8xf32>
    %28 = arith.truncf %27 : vector<2x8x8xf32> to vector<2x8x8xbf16>
    "tpu.trace_start"() <{level = 10 : i32, message = "bqk,bkd->bqd"}> : () -> ()
    %cst_10 = arith.constant dense<0.000000e+00> : vector<2x8x8xf32>
    %29 = tpu.matmul %28, %16, %cst_10 {dimension_numbers = #tpu.dot_dimension_numbers<[2], [1], [1], [2], [0, 0, 0, 1, 1, 2], [0], [0]>} : vector<2x8x8xbf16>, vector<2x8x8xbf16>, vector<2x8x8xf32> -> vector<2x8x8xf32>
    "tpu.trace_stop"() : () -> ()
    %30 = vector.shape_cast %29 : vector<2x8x8xf32> to vector<16x8xf32>
    %31 = vector.extract_strided_slice %7 {offsets = [0, 8], sizes = [16, 8], strides = [1, 1]} : vector<16x96xf32> to vector<16x8xf32>
    %32 = vector.shape_cast %31 : vector<16x8xf32> to vector<2x8x8xf32>
    %33 = arith.truncf %32 : vector<2x8x8xf32> to vector<2x8x8xbf16>
    %34 = vector.extract_strided_slice %7 {offsets = [0, 40], sizes = [16, 8], strides = [1, 1]} : vector<16x96xf32> to vector<16x8xf32>
    %35 = vector.shape_cast %34 : vector<16x8xf32> to vector<2x8x8xf32>
    %36 = arith.truncf %35 : vector<2x8x8xf32> to vector<2x8x8xbf16>
    %37 = vector.extract_strided_slice %7 {offsets = [0, 72], sizes = [16, 8], strides = [1, 1]} : vector<16x96xf32> to vector<16x8xf32>
    %38 = vector.shape_cast %37 : vector<16x8xf32> to vector<2x8x8xf32>
    %39 = arith.truncf %38 : vector<2x8x8xf32> to vector<2x8x8xbf16>
    "tpu.trace_start"() <{level = 10 : i32, message = "bqd,bkd->bqk"}> : () -> ()
    %cst_11 = arith.constant dense<0.000000e+00> : vector<2x8x8xf32>
    %40 = tpu.matmul %33, %36, %cst_11 {dimension_numbers = #tpu.dot_dimension_numbers<[2], [2], [1], [1], [0, 0, 0, 1, 1, 1], [0], [0]>} : vector<2x8x8xbf16>, vector<2x8x8xbf16>, vector<2x8x8xf32> -> vector<2x8x8xf32>
    "tpu.trace_stop"() : () -> ()
    %cst_12 = arith.constant dense<0xFF800000> : vector<2x8xf32>
    %41 = vector.multi_reduction <maximumf>, %40, %cst_12 [2] : vector<2x8x8xf32> to vector<2x8xf32>
    %42 = vector.shape_cast %41 : vector<2x8xf32> to vector<2x8x1xf32>
    %43 = vector.broadcast %42 : vector<2x8x1xf32> to vector<2x8x8xf32>
    %44 = arith.subf %40, %43 : vector<2x8x8xf32>
    %45 = math.exp %44 : vector<2x8x8xf32>
    %cst_13 = arith.constant dense<0.000000e+00> : vector<2x8xf32>
    %46 = vector.multi_reduction <add>, %45, %cst_13 [2] : vector<2x8x8xf32> to vector<2x8xf32>
    %47 = vector.shape_cast %46 : vector<2x8xf32> to vector<2x8x1xf32>
    %48 = tpu.reciprocal %47 {approx = true} : vector<2x8x1xf32> -> vector<2x8x1xf32>
    %49 = vector.broadcast %48 : vector<2x8x1xf32> to vector<2x8x8xf32>
    %50 = arith.mulf %45, %49 : vector<2x8x8xf32>
    %51 = arith.truncf %50 : vector<2x8x8xf32> to vector<2x8x8xbf16>
    "tpu.trace_start"() <{level = 10 : i32, message = "bqk,bkd->bqd"}> : () -> ()
    %cst_14 = arith.constant dense<0.000000e+00> : vector<2x8x8xf32>
    %52 = tpu.matmul %51, %39, %cst_14 {dimension_numbers = #tpu.dot_dimension_numbers<[2], [1], [1], [2], [0, 0, 0, 1, 1, 2], [0], [0]>} : vector<2x8x8xbf16>, vector<2x8x8xbf16>, vector<2x8x8xf32> -> vector<2x8x8xf32>
    "tpu.trace_stop"() : () -> ()
    %53 = vector.shape_cast %52 : vector<2x8x8xf32> to vector<16x8xf32>
    %54 = vector.extract_strided_slice %7 {offsets = [0, 16], sizes = [16, 8], strides = [1, 1]} : vector<16x96xf32> to vector<16x8xf32>
    %55 = vector.shape_cast %54 : vector<16x8xf32> to vector<2x8x8xf32>
    %56 = arith.truncf %55 : vector<2x8x8xf32> to vector<2x8x8xbf16>
    %57 = vector.extract_strided_slice %7 {offsets = [0, 48], sizes = [16, 8], strides = [1, 1]} : vector<16x96xf32> to vector<16x8xf32>
    %58 = vector.shape_cast %57 : vector<16x8xf32> to vector<2x8x8xf32>
    %59 = arith.truncf %58 : vector<2x8x8xf32> to vector<2x8x8xbf16>
    %60 = vector.extract_strided_slice %7 {offsets = [0, 80], sizes = [16, 8], strides = [1, 1]} : vector<16x96xf32> to vector<16x8xf32>
    %61 = vector.shape_cast %60 : vector<16x8xf32> to vector<2x8x8xf32>
    %62 = arith.truncf %61 : vector<2x8x8xf32> to vector<2x8x8xbf16>
    "tpu.trace_start"() <{level = 10 : i32, message = "bqd,bkd->bqk"}> : () -> ()
    %cst_15 = arith.constant dense<0.000000e+00> : vector<2x8x8xf32>
    %63 = tpu.matmul %56, %59, %cst_15 {dimension_numbers = #tpu.dot_dimension_numbers<[2], [2], [1], [1], [0, 0, 0, 1, 1, 1], [0], [0]>} : vector<2x8x8xbf16>, vector<2x8x8xbf16>, vector<2x8x8xf32> -> vector<2x8x8xf32>
    "tpu.trace_stop"() : () -> ()
    %cst_16 = arith.constant dense<0xFF800000> : vector<2x8xf32>
    %64 = vector.multi_reduction <maximumf>, %63, %cst_16 [2] : vector<2x8x8xf32> to vector<2x8xf32>
    %65 = vector.shape_cast %64 : vector<2x8xf32> to vector<2x8x1xf32>
    %66 = vector.broadcast %65 : vector<2x8x1xf32> to vector<2x8x8xf32>
    %67 = arith.subf %63, %66 : vector<2x8x8xf32>
    %68 = math.exp %67 : vector<2x8x8xf32>
    %cst_17 = arith.constant dense<0.000000e+00> : vector<2x8xf32>
    %69 = vector.multi_reduction <add>, %68, %cst_17 [2] : vector<2x8x8xf32> to vector<2x8xf32>
    %70 = vector.shape_cast %69 : vector<2x8xf32> to vector<2x8x1xf32>
    %71 = tpu.reciprocal %70 {approx = true} : vector<2x8x1xf32> -> vector<2x8x1xf32>
    %72 = vector.broadcast %71 : vector<2x8x1xf32> to vector<2x8x8xf32>
    %73 = arith.mulf %68, %72 : vector<2x8x8xf32>
    %74 = arith.truncf %73 : vector<2x8x8xf32> to vector<2x8x8xbf16>
    "tpu.trace_start"() <{level = 10 : i32, message = "bqk,bkd->bqd"}> : () -> ()
    %cst_18 = arith.constant dense<0.000000e+00> : vector<2x8x8xf32>
    %75 = tpu.matmul %74, %62, %cst_18 {dimension_numbers = #tpu.dot_dimension_numbers<[2], [1], [1], [2], [0, 0, 0, 1, 1, 2], [0], [0]>} : vector<2x8x8xbf16>, vector<2x8x8xbf16>, vector<2x8x8xf32> -> vector<2x8x8xf32>
    "tpu.trace_stop"() : () -> ()
    %76 = vector.shape_cast %75 : vector<2x8x8xf32> to vector<16x8xf32>
    %77 = vector.extract_strided_slice %7 {offsets = [0, 24], sizes = [16, 8], strides = [1, 1]} : vector<16x96xf32> to vector<16x8xf32>
    %78 = vector.shape_cast %77 : vector<16x8xf32> to vector<2x8x8xf32>
    %79 = arith.truncf %78 : vector<2x8x8xf32> to vector<2x8x8xbf16>
    %80 = vector.extract_strided_slice %7 {offsets = [0, 56], sizes = [16, 8], strides = [1, 1]} : vector<16x96xf32> to vector<16x8xf32>
    %81 = vector.shape_cast %80 : vector<16x8xf32> to vector<2x8x8xf32>
    %82 = arith.truncf %81 : vector<2x8x8xf32> to vector<2x8x8xbf16>
    %83 = vector.extract_strided_slice %7 {offsets = [0, 88], sizes = [16, 8], strides = [1, 1]} : vector<16x96xf32> to vector<16x8xf32>
    %84 = vector.shape_cast %83 : vector<16x8xf32> to vector<2x8x8xf32>
    %85 = arith.truncf %84 : vector<2x8x8xf32> to vector<2x8x8xbf16>
    "tpu.trace_start"() <{level = 10 : i32, message = "bqd,bkd->bqk"}> : () -> ()
    %cst_19 = arith.constant dense<0.000000e+00> : vector<2x8x8xf32>
    %86 = tpu.matmul %79, %82, %cst_19 {dimension_numbers = #tpu.dot_dimension_numbers<[2], [2], [1], [1], [0, 0, 0, 1, 1, 1], [0], [0]>} : vector<2x8x8xbf16>, vector<2x8x8xbf16>, vector<2x8x8xf32> -> vector<2x8x8xf32>
    "tpu.trace_stop"() : () -> ()
    %cst_20 = arith.constant dense<0xFF800000> : vector<2x8xf32>
    %87 = vector.multi_reduction <maximumf>, %86, %cst_20 [2] : vector<2x8x8xf32> to vector<2x8xf32>
    %88 = vector.shape_cast %87 : vector<2x8xf32> to vector<2x8x1xf32>
    %89 = vector.broadcast %88 : vector<2x8x1xf32> to vector<2x8x8xf32>
    %90 = arith.subf %86, %89 : vector<2x8x8xf32>
    %91 = math.exp %90 : vector<2x8x8xf32>
    %cst_21 = arith.constant dense<0.000000e+00> : vector<2x8xf32>
    %92 = vector.multi_reduction <add>, %91, %cst_21 [2] : vector<2x8x8xf32> to vector<2x8xf32>
    %93 = vector.shape_cast %92 : vector<2x8xf32> to vector<2x8x1xf32>
    %94 = tpu.reciprocal %93 {approx = true} : vector<2x8x1xf32> -> vector<2x8x1xf32>
    %95 = vector.broadcast %94 : vector<2x8x1xf32> to vector<2x8x8xf32>
    %96 = arith.mulf %91, %95 : vector<2x8x8xf32>
    %97 = arith.truncf %96 : vector<2x8x8xf32> to vector<2x8x8xbf16>
    "tpu.trace_start"() <{level = 10 : i32, message = "bqk,bkd->bqd"}> : () -> ()
    %cst_22 = arith.constant dense<0.000000e+00> : vector<2x8x8xf32>
    %98 = tpu.matmul %97, %85, %cst_22 {dimension_numbers = #tpu.dot_dimension_numbers<[2], [1], [1], [2], [0, 0, 0, 1, 1, 2], [0], [0]>} : vector<2x8x8xbf16>, vector<2x8x8xbf16>, vector<2x8x8xf32> -> vector<2x8x8xf32>
    "tpu.trace_stop"() : () -> ()
    %99 = vector.shape_cast %98 : vector<2x8x8xf32> to vector<16x8xf32>
    %100 = tpu.concatenate %30, %53, %76, %99 in 1 : vector<16x8xf32>, vector<16x8xf32>, vector<16x8xf32>, vector<16x8xf32> -> vector<16x32xf32>
    %c0_23 = arith.constant 0 : index
    %c0_24 = arith.constant 0 : index
    %101 = vector.load %arg5[%c0_23, %c0_24] : memref<32x32xbf16, #tpu.memory_space<vmem>>, vector<32x32xbf16>
    %102 = arith.truncf %100 : vector<16x32xf32> to vector<16x32xbf16>
    %cst_25 = arith.constant dense<0.000000e+00> : vector<16x32xf32>
    %103 = tpu.matmul %102, %101, %cst_25 {dimension_numbers = #tpu.dot_dimension_numbers<[1], [0], [0], [1], [0, 0, 1, 1], [], []>} : vector<16x32xbf16>, vector<32x32xbf16>, vector<16x32xf32> -> vector<16x32xf32>
    %c0_26 = arith.constant 0 : index
    %c0_27 = arith.constant 0 : index
    %104 = vector.load %arg6[%c0_26, %c0_27] : memref<1x32xf32, #tpu.memory_space<vmem>>, vector<1x32xf32>
    %105 = vector.broadcast %104 : vector<1x32xf32> to vector<16x32xf32>
    %106 = arith.addf %103, %105 : vector<16x32xf32>
    %107 = arith.addf %0, %106 : vector<16x32xf32>
    %c0_28 = arith.constant 0 : index
    %c0_29 = arith.constant 0 : index
    %108 = vector.load %arg13[%c0_28, %c0_29] : memref<2x32xf32, #tpu.memory_space<vmem>>, vector<2x32xf32>
    %109 = vector.extract_strided_slice %108 {offsets = [0, 0], sizes = [1, 32], strides = [1, 1]} : vector<2x32xf32> to vector<1x32xf32>
    %110 = vector.extract_strided_slice %108 {offsets = [1, 0], sizes = [1, 32], strides = [1, 1]} : vector<2x32xf32> to vector<1x32xf32>
    %cst_30 = arith.constant dense<0.000000e+00> : vector<16xf32>
    %111 = vector.multi_reduction <add>, %107, %cst_30 [1] : vector<16x32xf32> to vector<16xf32>
    %112 = vector.shape_cast %111 : vector<16xf32> to vector<16x1xf32>
    %cst_31 = arith.constant 3.200000e+01 : f32
    %113 = vector.broadcast %cst_31 : f32 to vector<16x1xf32>
    %114 = arith.divf %112, %113 : vector<16x1xf32>
    %115 = vector.broadcast %114 : vector<16x1xf32> to vector<16x32xf32>
    %116 = arith.subf %107, %115 : vector<16x32xf32>
    %117 = arith.mulf %116, %116 : vector<16x32xf32>
    %cst_32 = arith.constant dense<0.000000e+00> : vector<16xf32>
    %118 = vector.multi_reduction <add>, %117, %cst_32 [1] : vector<16x32xf32> to vector<16xf32>
    %119 = vector.shape_cast %118 : vector<16xf32> to vector<16x1xf32>
    %cst_33 = arith.constant 3.200000e+01 : f32
    %120 = vector.broadcast %cst_33 : f32 to vector<16x1xf32>
    %121 = arith.divf %119, %120 : vector<16x1xf32>
    %cst_34 = arith.constant 9.99999974E-6 : f32
    %122 = vector.broadcast %cst_34 : f32 to vector<16x1xf32>
    %123 = arith.addf %121, %122 : vector<16x1xf32>
    %124 = math.rsqrt %123 : vector<16x1xf32>
    %125 = vector.broadcast %124 : vector<16x1xf32> to vector<16x32xf32>
    %126 = arith.mulf %116, %125 : vector<16x32xf32>
    %127 = vector.broadcast %109 : vector<1x32xf32> to vector<16x32xf32>
    %128 = arith.mulf %126, %127 : vector<16x32xf32>
    %129 = vector.broadcast %110 : vector<1x32xf32> to vector<16x32xf32>
    %130 = arith.addf %128, %129 : vector<16x32xf32>
    %c0_35 = arith.constant 0 : index
    %c0_36 = arith.constant 0 : index
    %131 = vector.load %arg7[%c0_35, %c0_36] : memref<32x32xbf16, #tpu.memory_space<vmem>>, vector<32x32xbf16>
    %132 = arith.truncf %106 : vector<16x32xf32> to vector<16x32xbf16>
    %cst_37 = arith.constant dense<0.000000e+00> : vector<16x32xf32>
    %133 = tpu.matmul %132, %131, %cst_37 {dimension_numbers = #tpu.dot_dimension_numbers<[1], [0], [0], [1], [0, 0, 1, 1], [], []>} : vector<16x32xbf16>, vector<32x32xbf16>, vector<16x32xf32> -> vector<16x32xf32>
    %c0_38 = arith.constant 0 : index
    %c0_39 = arith.constant 0 : index
    %134 = vector.load %arg8[%c0_38, %c0_39] : memref<1x32xf32, #tpu.memory_space<vmem>>, vector<1x32xf32>
    %135 = vector.broadcast %134 : vector<1x32xf32> to vector<16x32xf32>
    %136 = arith.addf %133, %135 : vector<16x32xf32>
    %c0_40 = arith.constant 0 : index
    %c0_41 = arith.constant 0 : index
    %137 = vector.load %arg9[%c0_40, %c0_41] : memref<32x64xbf16, #tpu.memory_space<vmem>>, vector<32x64xbf16>
    %138 = arith.truncf %1 : vector<32x32xf32> to vector<32x32xbf16>
    %cst_42 = arith.constant dense<0.000000e+00> : vector<32x64xf32>
    %139 = tpu.matmul %138, %137, %cst_42 {dimension_numbers = #tpu.dot_dimension_numbers<[1], [0], [0], [1], [0, 0, 1, 1], [], []>} : vector<32x32xbf16>, vector<32x64xbf16>, vector<32x64xf32> -> vector<32x64xf32>
    %c0_43 = arith.constant 0 : index
    %c0_44 = arith.constant 0 : index
    %140 = vector.load %arg10[%c0_43, %c0_44] : memref<1x64xf32, #tpu.memory_space<vmem>>, vector<1x64xf32>
    %141 = vector.broadcast %140 : vector<1x64xf32> to vector<32x64xf32>
    %142 = arith.addf %139, %141 : vector<32x64xf32>
    %143 = vector.extract_strided_slice %136 {offsets = [0, 0], sizes = [16, 8], strides = [1, 1]} : vector<16x32xf32> to vector<16x8xf32>
    %144 = vector.shape_cast %143 : vector<16x8xf32> to vector<2x8x8xf32>
    %145 = arith.truncf %144 : vector<2x8x8xf32> to vector<2x8x8xbf16>
    %146 = vector.extract_strided_slice %142 {offsets = [0, 0], sizes = [32, 8], strides = [1, 1]} : vector<32x64xf32> to vector<32x8xf32>
    %147 = vector.shape_cast %146 : vector<32x8xf32> to vector<2x16x8xf32>
    %148 = arith.truncf %147 : vector<2x16x8xf32> to vector<2x16x8xbf16>
    %149 = vector.extract_strided_slice %142 {offsets = [0, 32], sizes = [32, 8], strides = [1, 1]} : vector<32x64xf32> to vector<32x8xf32>
    %150 = vector.shape_cast %149 : vector<32x8xf32> to vector<2x16x8xf32>
    %151 = arith.truncf %150 : vector<2x16x8xf32> to vector<2x16x8xbf16>
    "tpu.trace_start"() <{level = 10 : i32, message = "bqd,bkd->bqk"}> : () -> ()
    %cst_45 = arith.constant dense<0.000000e+00> : vector<2x8x16xf32>
    %152 = tpu.matmul %145, %148, %cst_45 {dimension_numbers = #tpu.dot_dimension_numbers<[2], [2], [1], [1], [0, 0, 0, 1, 1, 1], [0], [0]>} : vector<2x8x8xbf16>, vector<2x16x8xbf16>, vector<2x8x16xf32> -> vector<2x8x16xf32>
    "tpu.trace_stop"() : () -> ()
    %cst_46 = arith.constant dense<0xFF800000> : vector<2x8xf32>
    %153 = vector.multi_reduction <maximumf>, %152, %cst_46 [2] : vector<2x8x16xf32> to vector<2x8xf32>
    %154 = vector.shape_cast %153 : vector<2x8xf32> to vector<2x8x1xf32>
    %155 = vector.broadcast %154 : vector<2x8x1xf32> to vector<2x8x16xf32>
    %156 = arith.subf %152, %155 : vector<2x8x16xf32>
    %157 = math.exp %156 : vector<2x8x16xf32>
    %cst_47 = arith.constant dense<0.000000e+00> : vector<2x8xf32>
    %158 = vector.multi_reduction <add>, %157, %cst_47 [2] : vector<2x8x16xf32> to vector<2x8xf32>
    %159 = vector.shape_cast %158 : vector<2x8xf32> to vector<2x8x1xf32>
    %160 = tpu.reciprocal %159 {approx = true} : vector<2x8x1xf32> -> vector<2x8x1xf32>
    %161 = vector.broadcast %160 : vector<2x8x1xf32> to vector<2x8x16xf32>
    %162 = arith.mulf %157, %161 : vector<2x8x16xf32>
    %163 = arith.truncf %162 : vector<2x8x16xf32> to vector<2x8x16xbf16>
    "tpu.trace_start"() <{level = 10 : i32, message = "bqk,bkd->bqd"}> : () -> ()
    %cst_48 = arith.constant dense<0.000000e+00> : vector<2x8x8xf32>
    %164 = tpu.matmul %163, %151, %cst_48 {dimension_numbers = #tpu.dot_dimension_numbers<[2], [1], [1], [2], [0, 0, 0, 1, 1, 2], [0], [0]>} : vector<2x8x16xbf16>, vector<2x16x8xbf16>, vector<2x8x8xf32> -> vector<2x8x8xf32>
    "tpu.trace_stop"() : () -> ()
    %165 = vector.shape_cast %164 : vector<2x8x8xf32> to vector<16x8xf32>
    %166 = vector.extract_strided_slice %136 {offsets = [0, 8], sizes = [16, 8], strides = [1, 1]} : vector<16x32xf32> to vector<16x8xf32>
    %167 = vector.shape_cast %166 : vector<16x8xf32> to vector<2x8x8xf32>
    %168 = arith.truncf %167 : vector<2x8x8xf32> to vector<2x8x8xbf16>
    %169 = vector.extract_strided_slice %142 {offsets = [0, 8], sizes = [32, 8], strides = [1, 1]} : vector<32x64xf32> to vector<32x8xf32>
    %170 = vector.shape_cast %169 : vector<32x8xf32> to vector<2x16x8xf32>
    %171 = arith.truncf %170 : vector<2x16x8xf32> to vector<2x16x8xbf16>
    %172 = vector.extract_strided_slice %142 {offsets = [0, 40], sizes = [32, 8], strides = [1, 1]} : vector<32x64xf32> to vector<32x8xf32>
    %173 = vector.shape_cast %172 : vector<32x8xf32> to vector<2x16x8xf32>
    %174 = arith.truncf %173 : vector<2x16x8xf32> to vector<2x16x8xbf16>
    "tpu.trace_start"() <{level = 10 : i32, message = "bqd,bkd->bqk"}> : () -> ()
    %cst_49 = arith.constant dense<0.000000e+00> : vector<2x8x16xf32>
    %175 = tpu.matmul %168, %171, %cst_49 {dimension_numbers = #tpu.dot_dimension_numbers<[2], [2], [1], [1], [0, 0, 0, 1, 1, 1], [0], [0]>} : vector<2x8x8xbf16>, vector<2x16x8xbf16>, vector<2x8x16xf32> -> vector<2x8x16xf32>
    "tpu.trace_stop"() : () -> ()
    %cst_50 = arith.constant dense<0xFF800000> : vector<2x8xf32>
    %176 = vector.multi_reduction <maximumf>, %175, %cst_50 [2] : vector<2x8x16xf32> to vector<2x8xf32>
    %177 = vector.shape_cast %176 : vector<2x8xf32> to vector<2x8x1xf32>
    %178 = vector.broadcast %177 : vector<2x8x1xf32> to vector<2x8x16xf32>
    %179 = arith.subf %175, %178 : vector<2x8x16xf32>
    %180 = math.exp %179 : vector<2x8x16xf32>
    %cst_51 = arith.constant dense<0.000000e+00> : vector<2x8xf32>
    %181 = vector.multi_reduction <add>, %180, %cst_51 [2] : vector<2x8x16xf32> to vector<2x8xf32>
    %182 = vector.shape_cast %181 : vector<2x8xf32> to vector<2x8x1xf32>
    %183 = tpu.reciprocal %182 {approx = true} : vector<2x8x1xf32> -> vector<2x8x1xf32>
    %184 = vector.broadcast %183 : vector<2x8x1xf32> to vector<2x8x16xf32>
    %185 = arith.mulf %180, %184 : vector<2x8x16xf32>
    %186 = arith.truncf %185 : vector<2x8x16xf32> to vector<2x8x16xbf16>
    "tpu.trace_start"() <{level = 10 : i32, message = "bqk,bkd->bqd"}> : () -> ()
    %cst_52 = arith.constant dense<0.000000e+00> : vector<2x8x8xf32>
    %187 = tpu.matmul %186, %174, %cst_52 {dimension_numbers = #tpu.dot_dimension_numbers<[2], [1], [1], [2], [0, 0, 0, 1, 1, 2], [0], [0]>} : vector<2x8x16xbf16>, vector<2x16x8xbf16>, vector<2x8x8xf32> -> vector<2x8x8xf32>
    "tpu.trace_stop"() : () -> ()
    %188 = vector.shape_cast %187 : vector<2x8x8xf32> to vector<16x8xf32>
    %189 = vector.extract_strided_slice %136 {offsets = [0, 16], sizes = [16, 8], strides = [1, 1]} : vector<16x32xf32> to vector<16x8xf32>
    %190 = vector.shape_cast %189 : vector<16x8xf32> to vector<2x8x8xf32>
    %191 = arith.truncf %190 : vector<2x8x8xf32> to vector<2x8x8xbf16>
    %192 = vector.extract_strided_slice %142 {offsets = [0, 16], sizes = [32, 8], strides = [1, 1]} : vector<32x64xf32> to vector<32x8xf32>
    %193 = vector.shape_cast %192 : vector<32x8xf32> to vector<2x16x8xf32>
    %194 = arith.truncf %193 : vector<2x16x8xf32> to vector<2x16x8xbf16>
    %195 = vector.extract_strided_slice %142 {offsets = [0, 48], sizes = [32, 8], strides = [1, 1]} : vector<32x64xf32> to vector<32x8xf32>
    %196 = vector.shape_cast %195 : vector<32x8xf32> to vector<2x16x8xf32>
    %197 = arith.truncf %196 : vector<2x16x8xf32> to vector<2x16x8xbf16>
    "tpu.trace_start"() <{level = 10 : i32, message = "bqd,bkd->bqk"}> : () -> ()
    %cst_53 = arith.constant dense<0.000000e+00> : vector<2x8x16xf32>
    %198 = tpu.matmul %191, %194, %cst_53 {dimension_numbers = #tpu.dot_dimension_numbers<[2], [2], [1], [1], [0, 0, 0, 1, 1, 1], [0], [0]>} : vector<2x8x8xbf16>, vector<2x16x8xbf16>, vector<2x8x16xf32> -> vector<2x8x16xf32>
    "tpu.trace_stop"() : () -> ()
    %cst_54 = arith.constant dense<0xFF800000> : vector<2x8xf32>
    %199 = vector.multi_reduction <maximumf>, %198, %cst_54 [2] : vector<2x8x16xf32> to vector<2x8xf32>
    %200 = vector.shape_cast %199 : vector<2x8xf32> to vector<2x8x1xf32>
    %201 = vector.broadcast %200 : vector<2x8x1xf32> to vector<2x8x16xf32>
    %202 = arith.subf %198, %201 : vector<2x8x16xf32>
    %203 = math.exp %202 : vector<2x8x16xf32>
    %cst_55 = arith.constant dense<0.000000e+00> : vector<2x8xf32>
    %204 = vector.multi_reduction <add>, %203, %cst_55 [2] : vector<2x8x16xf32> to vector<2x8xf32>
    %205 = vector.shape_cast %204 : vector<2x8xf32> to vector<2x8x1xf32>
    %206 = tpu.reciprocal %205 {approx = true} : vector<2x8x1xf32> -> vector<2x8x1xf32>
    %207 = vector.broadcast %206 : vector<2x8x1xf32> to vector<2x8x16xf32>
    %208 = arith.mulf %203, %207 : vector<2x8x16xf32>
    %209 = arith.truncf %208 : vector<2x8x16xf32> to vector<2x8x16xbf16>
    "tpu.trace_start"() <{level = 10 : i32, message = "bqk,bkd->bqd"}> : () -> ()
    %cst_56 = arith.constant dense<0.000000e+00> : vector<2x8x8xf32>
    %210 = tpu.matmul %209, %197, %cst_56 {dimension_numbers = #tpu.dot_dimension_numbers<[2], [1], [1], [2], [0, 0, 0, 1, 1, 2], [0], [0]>} : vector<2x8x16xbf16>, vector<2x16x8xbf16>, vector<2x8x8xf32> -> vector<2x8x8xf32>
    "tpu.trace_stop"() : () -> ()
    %211 = vector.shape_cast %210 : vector<2x8x8xf32> to vector<16x8xf32>
    %212 = vector.extract_strided_slice %136 {offsets = [0, 24], sizes = [16, 8], strides = [1, 1]} : vector<16x32xf32> to vector<16x8xf32>
    %213 = vector.shape_cast %212 : vector<16x8xf32> to vector<2x8x8xf32>
    %214 = arith.truncf %213 : vector<2x8x8xf32> to vector<2x8x8xbf16>
    %215 = vector.extract_strided_slice %142 {offsets = [0, 24], sizes = [32, 8], strides = [1, 1]} : vector<32x64xf32> to vector<32x8xf32>
    %216 = vector.shape_cast %215 : vector<32x8xf32> to vector<2x16x8xf32>
    %217 = arith.truncf %216 : vector<2x16x8xf32> to vector<2x16x8xbf16>
    %218 = vector.extract_strided_slice %142 {offsets = [0, 56], sizes = [32, 8], strides = [1, 1]} : vector<32x64xf32> to vector<32x8xf32>
    %219 = vector.shape_cast %218 : vector<32x8xf32> to vector<2x16x8xf32>
    %220 = arith.truncf %219 : vector<2x16x8xf32> to vector<2x16x8xbf16>
    "tpu.trace_start"() <{level = 10 : i32, message = "bqd,bkd->bqk"}> : () -> ()
    %cst_57 = arith.constant dense<0.000000e+00> : vector<2x8x16xf32>
    %221 = tpu.matmul %214, %217, %cst_57 {dimension_numbers = #tpu.dot_dimension_numbers<[2], [2], [1], [1], [0, 0, 0, 1, 1, 1], [0], [0]>} : vector<2x8x8xbf16>, vector<2x16x8xbf16>, vector<2x8x16xf32> -> vector<2x8x16xf32>
    "tpu.trace_stop"() : () -> ()
    %cst_58 = arith.constant dense<0xFF800000> : vector<2x8xf32>
    %222 = vector.multi_reduction <maximumf>, %221, %cst_58 [2] : vector<2x8x16xf32> to vector<2x8xf32>
    %223 = vector.shape_cast %222 : vector<2x8xf32> to vector<2x8x1xf32>
    %224 = vector.broadcast %223 : vector<2x8x1xf32> to vector<2x8x16xf32>
    %225 = arith.subf %221, %224 : vector<2x8x16xf32>
    %226 = math.exp %225 : vector<2x8x16xf32>
    %cst_59 = arith.constant dense<0.000000e+00> : vector<2x8xf32>
    %227 = vector.multi_reduction <add>, %226, %cst_59 [2] : vector<2x8x16xf32> to vector<2x8xf32>
    %228 = vector.shape_cast %227 : vector<2x8xf32> to vector<2x8x1xf32>
    %229 = tpu.reciprocal %228 {approx = true} : vector<2x8x1xf32> -> vector<2x8x1xf32>
    %230 = vector.broadcast %229 : vector<2x8x1xf32> to vector<2x8x16xf32>
    %231 = arith.mulf %226, %230 : vector<2x8x16xf32>
    %232 = arith.truncf %231 : vector<2x8x16xf32> to vector<2x8x16xbf16>
    "tpu.trace_start"() <{level = 10 : i32, message = "bqk,bkd->bqd"}> : () -> ()
    %cst_60 = arith.constant dense<0.000000e+00> : vector<2x8x8xf32>
    %233 = tpu.matmul %232, %220, %cst_60 {dimension_numbers = #tpu.dot_dimension_numbers<[2], [1], [1], [2], [0, 0, 0, 1, 1, 2], [0], [0]>} : vector<2x8x16xbf16>, vector<2x16x8xbf16>, vector<2x8x8xf32> -> vector<2x8x8xf32>
    "tpu.trace_stop"() : () -> ()
    %234 = vector.shape_cast %233 : vector<2x8x8xf32> to vector<16x8xf32>
    %235 = tpu.concatenate %165, %188, %211, %234 in 1 : vector<16x8xf32>, vector<16x8xf32>, vector<16x8xf32>, vector<16x8xf32> -> vector<16x32xf32>
    %c0_61 = arith.constant 0 : index
    %c0_62 = arith.constant 0 : index
    %236 = vector.load %arg11[%c0_61, %c0_62] : memref<32x32xbf16, #tpu.memory_space<vmem>>, vector<32x32xbf16>
    %237 = arith.truncf %235 : vector<16x32xf32> to vector<16x32xbf16>
    %cst_63 = arith.constant dense<0.000000e+00> : vector<16x32xf32>
    %238 = tpu.matmul %237, %236, %cst_63 {dimension_numbers = #tpu.dot_dimension_numbers<[1], [0], [0], [1], [0, 0, 1, 1], [], []>} : vector<16x32xbf16>, vector<32x32xbf16>, vector<16x32xf32> -> vector<16x32xf32>
    %c0_64 = arith.constant 0 : index
    %c0_65 = arith.constant 0 : index
    %239 = vector.load %arg12[%c0_64, %c0_65] : memref<1x32xf32, #tpu.memory_space<vmem>>, vector<1x32xf32>
    %240 = vector.broadcast %239 : vector<1x32xf32> to vector<16x32xf32>
    %241 = arith.addf %238, %240 : vector<16x32xf32>
    %242 = arith.addf %130, %241 : vector<16x32xf32>
    %c0_66 = arith.constant 0 : index
    %c0_67 = arith.constant 0 : index
    %243 = vector.load %arg14[%c0_66, %c0_67] : memref<2x32xf32, #tpu.memory_space<vmem>>, vector<2x32xf32>
    %244 = vector.extract_strided_slice %243 {offsets = [0, 0], sizes = [1, 32], strides = [1, 1]} : vector<2x32xf32> to vector<1x32xf32>
    %245 = vector.extract_strided_slice %243 {offsets = [1, 0], sizes = [1, 32], strides = [1, 1]} : vector<2x32xf32> to vector<1x32xf32>
    %cst_68 = arith.constant dense<0.000000e+00> : vector<16xf32>
    %246 = vector.multi_reduction <add>, %242, %cst_68 [1] : vector<16x32xf32> to vector<16xf32>
    %247 = vector.shape_cast %246 : vector<16xf32> to vector<16x1xf32>
    %cst_69 = arith.constant 3.200000e+01 : f32
    %248 = vector.broadcast %cst_69 : f32 to vector<16x1xf32>
    %249 = arith.divf %247, %248 : vector<16x1xf32>
    %250 = vector.broadcast %249 : vector<16x1xf32> to vector<16x32xf32>
    %251 = arith.subf %242, %250 : vector<16x32xf32>
    %252 = arith.mulf %251, %251 : vector<16x32xf32>
    %cst_70 = arith.constant dense<0.000000e+00> : vector<16xf32>
    %253 = vector.multi_reduction <add>, %252, %cst_70 [1] : vector<16x32xf32> to vector<16xf32>
    %254 = vector.shape_cast %253 : vector<16xf32> to vector<16x1xf32>
    %cst_71 = arith.constant 3.200000e+01 : f32
    %255 = vector.broadcast %cst_71 : f32 to vector<16x1xf32>
    %256 = arith.divf %254, %255 : vector<16x1xf32>
    %cst_72 = arith.constant 9.99999974E-6 : f32
    %257 = vector.broadcast %cst_72 : f32 to vector<16x1xf32>
    %258 = arith.addf %256, %257 : vector<16x1xf32>
    %259 = math.rsqrt %258 : vector<16x1xf32>
    %260 = vector.broadcast %259 : vector<16x1xf32> to vector<16x32xf32>
    %261 = arith.mulf %251, %260 : vector<16x32xf32>
    %262 = vector.broadcast %244 : vector<1x32xf32> to vector<16x32xf32>
    %263 = arith.mulf %261, %262 : vector<16x32xf32>
    %264 = vector.broadcast %245 : vector<1x32xf32> to vector<16x32xf32>
    %265 = arith.addf %263, %264 : vector<16x32xf32>
    %c0_73 = arith.constant 0 : index
    %c0_74 = arith.constant 0 : index
    %266 = vector.load %arg16[%c0_73, %c0_74] : memref<32x64xbf16, #tpu.memory_space<vmem>>, vector<32x64xbf16>
    %267 = arith.truncf %265 : vector<16x32xf32> to vector<16x32xbf16>
    %cst_75 = arith.constant dense<0.000000e+00> : vector<16x64xf32>
    %268 = tpu.matmul %267, %266, %cst_75 {dimension_numbers = #tpu.dot_dimension_numbers<[1], [0], [0], [1], [0, 0, 1, 1], [], []>} : vector<16x32xbf16>, vector<32x64xbf16>, vector<16x64xf32> -> vector<16x64xf32>
    %c0_76 = arith.constant 0 : index
    %c0_77 = arith.constant 0 : index
    %269 = vector.load %arg17[%c0_76, %c0_77] : memref<1x64xf32, #tpu.memory_space<vmem>>, vector<1x64xf32>
    %270 = vector.broadcast %269 : vector<1x64xf32> to vector<16x64xf32>
    %271 = arith.addf %268, %270 : vector<16x64xf32>
    %cst_78 = arith.constant 0.000000e+00 : f32
    %272 = vector.broadcast %cst_78 : f32 to vector<16x64xf32>
    %273 = arith.maximumf %271, %272 : vector<16x64xf32>
    %c0_79 = arith.constant 0 : index
    %c0_80 = arith.constant 0 : index
    %274 = vector.load %arg18[%c0_79, %c0_80] : memref<64x32xbf16, #tpu.memory_space<vmem>>, vector<64x32xbf16>
    %275 = arith.truncf %273 : vector<16x64xf32> to vector<16x64xbf16>
    %cst_81 = arith.constant dense<0.000000e+00> : vector<16x32xf32>
    %276 = tpu.matmul %275, %274, %cst_81 {dimension_numbers = #tpu.dot_dimension_numbers<[1], [0], [0], [1], [0, 0, 1, 1], [], []>} : vector<16x64xbf16>, vector<64x32xbf16>, vector<16x32xf32> -> vector<16x32xf32>
    %c0_82 = arith.constant 0 : index
    %c0_83 = arith.constant 0 : index
    %277 = vector.load %arg19[%c0_82, %c0_83] : memref<1x32xf32, #tpu.memory_space<vmem>>, vector<1x32xf32>
    %278 = vector.broadcast %277 : vector<1x32xf32> to vector<16x32xf32>
    %279 = arith.addf %276, %278 : vector<16x32xf32>
    %280 = arith.addf %265, %279 : vector<16x32xf32>
    %c0_84 = arith.constant 0 : index
    %c0_85 = arith.constant 0 : index
    %281 = vector.load %arg15[%c0_84, %c0_85] : memref<2x32xf32, #tpu.memory_space<vmem>>, vector<2x32xf32>
    %282 = vector.extract_strided_slice %281 {offsets = [0, 0], sizes = [1, 32], strides = [1, 1]} : vector<2x32xf32> to vector<1x32xf32>
    %283 = vector.extract_strided_slice %281 {offsets = [1, 0], sizes = [1, 32], strides = [1, 1]} : vector<2x32xf32> to vector<1x32xf32>
    %cst_86 = arith.constant dense<0.000000e+00> : vector<16xf32>
    %284 = vector.multi_reduction <add>, %280, %cst_86 [1] : vector<16x32xf32> to vector<16xf32>
    %285 = vector.shape_cast %284 : vector<16xf32> to vector<16x1xf32>
    %cst_87 = arith.constant 3.200000e+01 : f32
    %286 = vector.broadcast %cst_87 : f32 to vector<16x1xf32>
    %287 = arith.divf %285, %286 : vector<16x1xf32>
    %288 = vector.broadcast %287 : vector<16x1xf32> to vector<16x32xf32>
    %289 = arith.subf %280, %288 : vector<16x32xf32>
    %290 = arith.mulf %289, %289 : vector<16x32xf32>
    %cst_88 = arith.constant dense<0.000000e+00> : vector<16xf32>
    %291 = vector.multi_reduction <add>, %290, %cst_88 [1] : vector<16x32xf32> to vector<16xf32>
    %292 = vector.shape_cast %291 : vector<16xf32> to vector<16x1xf32>
    %cst_89 = arith.constant 3.200000e+01 : f32
    %293 = vector.broadcast %cst_89 : f32 to vector<16x1xf32>
    %294 = arith.divf %292, %293 : vector<16x1xf32>
    %cst_90 = arith.constant 9.99999974E-6 : f32
    %295 = vector.broadcast %cst_90 : f32 to vector<16x1xf32>
    %296 = arith.addf %294, %295 : vector<16x1xf32>
    %297 = math.rsqrt %296 : vector<16x1xf32>
    %298 = vector.broadcast %297 : vector<16x1xf32> to vector<16x32xf32>
    %299 = arith.mulf %289, %298 : vector<16x32xf32>
    %300 = vector.broadcast %282 : vector<1x32xf32> to vector<16x32xf32>
    %301 = arith.mulf %299, %300 : vector<16x32xf32>
    %302 = vector.broadcast %283 : vector<1x32xf32> to vector<16x32xf32>
    %303 = arith.addf %301, %302 : vector<16x32xf32>
    %c0_91 = arith.constant 0 : index
    %c0_92 = arith.constant 0 : index
    %304 = vector.load %arg20[%c0_91, %c0_92] : memref<16x32xf32, #tpu.memory_space<vmem>>, vector<16x32xf32>
    tpu.vector_store %arg20[%c0_91, %c0_92], %303 {strides = array<i32>} : memref<16x32xf32, #tpu.memory_space<vmem>>, vector<16x32xf32>,
    return
  }
  func.func @transform_0(%arg0: i32) -> (i32, i32) {
    %c0_i32 = arith.constant 0 : i32
    %c0_i32_0 = arith.constant 0 : i32
    return %arg0, %c0_i32 : i32, i32
  }
  func.func @transform_1(%arg0: i32) -> (i32, i32) {
    %c0_i32 = arith.constant 0 : i32
    %c0_i32_0 = arith.constant 0 : i32
    return %arg0, %c0_i32 : i32, i32
  }
  func.func @transform_2(%arg0: i32) -> (i32, i32) {
    %c0_i32 = arith.constant 0 : i32
    %c0_i32_0 = arith.constant 0 : i32
    %c0_i32_1 = arith.constant 0 : i32
    return %c0_i32, %c0_i32_0 : i32, i32
  }
  func.func @transform_3(%arg0: i32) -> (i32, i32) {
    %c0_i32 = arith.constant 0 : i32
    %c0_i32_0 = arith.constant 0 : i32
    %c0_i32_1 = arith.constant 0 : i32
    return %c0_i32, %c0_i32_0 : i32, i32
  }
  func.func @transform_4(%arg0: i32) -> (i32, i32) {
    %c0_i32 = arith.constant 0 : i32
    %c0_i32_0 = arith.constant 0 : i32
    %c0_i32_1 = arith.constant 0 : i32
    return %c0_i32, %c0_i32_0 : i32, i32
  }
  func.func @transform_5(%arg0: i32) -> (i32, i32) {
    %c0_i32 = arith.constant 0 : i32
    %c0_i32_0 = arith.constant 0 : i32
    %c0_i32_1 = arith.constant 0 : i32
    return %c0_i32, %c0_i32_0 : i32, i32
  }
  func.func @transform_6(%arg0: i32) -> (i32, i32) {
    %c0_i32 = arith.constant 0 : i32
    %c0_i32_0 = arith.constant 0 : i32
    %c0_i32_1 = arith.constant 0 : i32
    return %c0_i32, %c0_i32_0 : i32, i32
  }
  func.func @transform_7(%arg0: i32) -> (i32, i32) {
    %c0_i32 = arith.constant 0 : i32
    %c0_i32_0 = arith.constant 0 : i32
    %c0_i32_1 = arith.constant 0 : i32
    return %c0_i32, %c0_i32_0 : i32, i32
  }
  func.func @transform_8(%arg0: i32) -> (i32, i32) {
    %c0_i32 = arith.constant 0 : i32
    %c0_i32_0 = arith.constant 0 : i32
    %c0_i32_1 = arith.constant 0 : i32
    return %c0_i32, %c0_i32_0 : i32, i32
  }
  func.func @transform_9(%arg0: i32) -> (i32, i32) {
    %c0_i32 = arith.constant 0 : i32
    %c0_i32_0 = arith.constant 0 : i32
    %c0_i32_1 = arith.constant 0 : i32
    return %c0_i32, %c0_i32_0 : i32, i32
  }
  func.func @transform_10(%arg0: i32) -> (i32, i32) {
    %c0_i32 = arith.constant 0 : i32
    %c0_i32_0 = arith.constant 0 : i32
    %c0_i32_1 = arith.constant 0 : i32
    return %c0_i32, %c0_i32_0 : i32, i32
  }
  func.func @transform_11(%arg0: i32) -> (i32, i32) {
    %c0_i32 = arith.constant 0 : i32
    %c0_i32_0 = arith.constant 0 : i32
    %c0_i32_1 = arith.constant 0 : i32
    return %c0_i32, %c0_i32_0 : i32, i32
  }
  func.func @transform_12(%arg0: i32) -> (i32, i32) {
    %c0_i32 = arith.constant 0 : i32
    %c0_i32_0 = arith.constant 0 : i32
    %c0_i32_1 = arith.constant 0 : i32
    return %c0_i32, %c0_i32_0 : i32, i32
  }
  func.func @transform_13(%arg0: i32) -> (i32, i32) {
    %c0_i32 = arith.constant 0 : i32
    %c0_i32_0 = arith.constant 0 : i32
    %c0_i32_1 = arith.constant 0 : i32
    return %c0_i32, %c0_i32_0 : i32, i32
  }
  func.func @transform_14(%arg0: i32) -> (i32, i32) {
    %c0_i32 = arith.constant 0 : i32
    %c0_i32_0 = arith.constant 0 : i32
    %c0_i32_1 = arith.constant 0 : i32
    return %c0_i32, %c0_i32_0 : i32, i32
  }
  func.func @transform_15(%arg0: i32) -> (i32, i32) {
    %c0_i32 = arith.constant 0 : i32
    %c0_i32_0 = arith.constant 0 : i32
    %c0_i32_1 = arith.constant 0 : i32
    return %c0_i32, %c0_i32_0 : i32, i32
  }
  func.func @transform_16(%arg0: i32) -> (i32, i32) {
    %c0_i32 = arith.constant 0 : i32
    %c0_i32_0 = arith.constant 0 : i32
    %c0_i32_1 = arith.constant 0 : i32
    return %c0_i32, %c0_i32_0 : i32, i32
  }
  func.func @transform_17(%arg0: i32) -> (i32, i32) {
    %c0_i32 = arith.constant 0 : i32
    %c0_i32_0 = arith.constant 0 : i32
    %c0_i32_1 = arith.constant 0 : i32
    return %c0_i32, %c0_i32_0 : i32, i32
  }
  func.func @transform_18(%arg0: i32) -> (i32, i32) {
    %c0_i32 = arith.constant 0 : i32
    %c0_i32_0 = arith.constant 0 : i32
    %c0_i32_1 = arith.constant 0 : i32
    return %c0_i32, %c0_i32_0 : i32, i32
  }
  func.func @transform_19(%arg0: i32) -> (i32, i32) {
    %c0_i32 = arith.constant 0 : i32
    %c0_i32_0 = arith.constant 0 : i32
    return %arg0, %c0_i32 : i32, i32
  }
}

</mosaic_0001>

<bundles_post_ra>
// kernel: _forward.1
= control target key start
LH: loop header
LB: loop body
LE: loop exit
PB: predicated region body
PF: predicated region fallthrough
CT: control target
= control target key end

     0   :  { %s2887_s0 = inlined_call_operand.vmem [shape: f32[16,32], index: 0, kind: input, shape index: {}]   ;;  %s2888_s1 = inlined_call_operand.vmem [shape: f32[32,32], index: 1, kind: input, shape index: {}]   ;;  %s2889_s2 = inlined_call_operand.hbm [shape: bf16[32,96], index: 2, kind: input, shape index: {}]   ;;  %s2890_s3 = inlined_call_operand.vmem [shape: f32[1,96], index: 3, kind: input, shape index: {}]   ;;  %s2891_s4 = inlined_call_operand.hbm [shape: bf16[32,32], index: 4, kind: input, shape index: {}]   ;;  %s2892_s5 = inlined_call_operand.hbm [shape: f32[1,32], index: 5, kind: input, shape index: {}]   ;;  %s2893_s6 = inlined_call_operand.hbm [shape: bf16[32,32], index: 6, kind: input, shape index: {}]   ;;  %s2894_s7 = inlined_call_operand.hbm [shape: f32[1,32], index: 7, kind: input, shape index: {}]   ;;  %s2895_s8 = inlined_call_operand.hbm [shape: bf16[32,64], index: 8, kind: input, shape index: {}]   ;;  %s2896_s9 = inlined_call_operand.hbm [shape: f32[1,64], index: 9, kind: input, shape index: {}]   ;;  %s2897_s10 = inlined_call_operand.hbm [shape: bf16[32,32], index: 10, kind: input, shape index: {}]   ;;  %s2898_s11 = inlined_call_operand.hbm [shape: f32[1,32], index: 11, kind: input, shape index: {}]   ;;  %s2899_s12 = inlined_call_operand.hbm [shape: f32[2,32], index: 12, kind: input, shape index: {}]   ;;  %s2900_s13 = inlined_call_operand.hbm [shape: f32[2,32], index: 13, kind: input, shape index: {}]   ;;  %s2901_s14 = inlined_call_operand.hbm [shape: f32[2,32], index: 14, kind: input, shape index: {}]   ;;  %s2902_s15 = inlined_call_operand.vmem [shape: bf16[32,64], index: 15, kind: input, shape index: {}]   ;;  %s2903_s16 = inlined_call_operand.hbm [shape: f32[1,64], index: 16, kind: input, shape index: {}]   ;;  %s2904_s17 = inlined_call_operand.vmem [shape: bf16[64,32], index: 17, kind: input, shape index: {}]   ;;  %s2905_s18 = inlined_call_operand.hbm [shape: f32[1,32], index: 18, kind: input, shape index: {}]   ;;  %s2906_s19 = inlined_call_operand.hbm [shape: f32[16,32], index: 19, kind: output, shape index: {}]  }
   0x1   :  { %2909 = sst [smem:[#allocation35_spill]] %s2887_s0 }
   0x2   :  { %2910 = sst [smem:[#allocation36_spill]] %s2888_s1 }
   0x3   :  { %2911 = sst [smem:[#allocation37_spill]] %s2889_s2 }
   0x4   :  { %2912 = sst [smem:[#allocation38_spill]] %s2890_s3 }
   0x5   :  { %24 = vsyncpa [#allocation3], 0 }
   0x6   :  { %25 = vsyncpa [#allocation6], 0 }
   0x7   :  { %26 = vsyncpa [#allocation9], 0 }
   0x8   :  { %27 = vsyncpa [#allocation12], 0 }
   0x9   :  { %28 = vsyncpa [#allocation15], 0 }
   0xa   :  { %29 = vsyncpa [#allocation18], 0 }
   0xb   :  { %30 = vsyncpa [#allocation21], 0 }
   0xc   :  { %31 = vsyncpa [#allocation24], 0 }
   0xd   :  { %32 = vsyncpa [#allocation4], 0  ;;  %s56_s20 = sshll.u32 %s2891_s4, 4  ;;  %s2368_s21 = smov [#allocation5]   ;;  %s57_s20 = int_to_ptr.hbm [resolvable:$true] %s56_s20 }
   0xe   :  { %s58_s1 = sshll.u32 %s2368_s21, 4  ;;  %s80_s23 = sshll.u32 %s2893_s6, 4  ;;  %s59_s1 = int_to_ptr.vmem [resolvable:$true] %s58_s1  ;;  %s81_s23 = int_to_ptr.hbm [resolvable:$true] %s80_s23 }
   0xf   :  { %s2369_s24 = smov 64   ;;  %s2370_s25 = smov 4  }
  0x10   :  { %64 = dma.hbm_to_vmem [thread:$0]  %s57_s20, 256, %s59_s1, [#allocation6], %s2369_s24, %s2369_s24, %s2370_s25  }
  0x11   :  { %s2371_s3 = smov [#allocation8]   ;;  %s104_s4 = sshll.u32 %s2895_s8, 4  ;;  %s105_s4 = int_to_ptr.hbm [resolvable:$true] %s104_s4 }
  0x12   :  { %s82_s26 = sshll.u32 %s2371_s3, 4  ;;  %s128_s0 = sshll.u32 %s2897_s10, 4  ;;  %s83_s26 = int_to_ptr.vmem [resolvable:$true] %s82_s26  ;;  %s129_s0 = int_to_ptr.hbm [resolvable:$true] %s128_s0 }
  0x13   :  { %88 = dma.hbm_to_vmem [thread:$0]  %s81_s23, 256, %s83_s26, [#allocation9], %s2369_s24, %s2369_s24, %s2370_s25  }
  0x14   :  { %s2372_s30 = smov [#allocation11]   ;;  %s2373_s20 = smov [#allocation14]  }
  0x15   :  { %s106_s21 = sshll.u32 %s2372_s30, 4  ;;  %s130_s8 = sshll.u32 %s2373_s20, 4  ;;  %s107_s21 = int_to_ptr.vmem [resolvable:$true] %s106_s21  ;;  %s131_s8 = int_to_ptr.vmem [resolvable:$true] %s130_s8 }
  0x16   :  { %112 = dma.hbm_to_vmem [thread:$0]  %s105_s4, 256, %s107_s21, [#allocation12], %s2369_s24, %s2369_s24, %s2370_s25  }
  0x17   :  { %s153_s2 = sshll.u32 %s2899_s12, 4  ;;  %s175_s3 = sshll.u32 %s2901_s14, 4  ;;  %s154_s2 = int_to_ptr.hbm [resolvable:$true] %s153_s2  ;;  %s176_s3 = int_to_ptr.hbm [resolvable:$true] %s175_s3 }
  0x18   :  { %136 = dma.hbm_to_vmem [thread:$0]  %s129_s0, 256, %s131_s8, [#allocation15], %s2369_s24, %s2369_s24, %s2370_s25  }
  0x19   :  { %s2374_s26 = smov [#allocation17]   ;;  %s2375_s28 = smov [#allocation20]  }
  0x1a   :  { %s155_s27 = sshll.u32 %s2374_s26, 4  ;;  %s177_s4 = sshll.u32 %s2375_s28, 4  ;;  %s156_s27 = int_to_ptr.vmem [resolvable:$true] %s155_s27  ;;  %s178_s4 = int_to_ptr.vmem [resolvable:$true] %s177_s4 }
  0x1b   :  { %158 = dma.hbm_to_vmem [thread:$0]  %s154_s2, 32, %s156_s27, [#allocation18]  }
  0x1c   :  { %s2913_s12 = sld [smem:[#allocation37_spill]]  ;;  %s70_s20 = sshll.u32 %s2892_s5, 4  ;;  %s71_s20 = int_to_ptr.hbm [resolvable:$true] %s70_s20 }
  0x1d   :  { %180 = dma.hbm_to_vmem [thread:$0]  %s176_s3, 32, %s178_s4, [#allocation21]  }
  0x1e   :  { %s2376_s8 = smov [#allocation2]   ;;  %s2377_s1 = smov [#allocation7]  }
  0x1f   :  { %s43_s14 = sshll.u32 %s2376_s8, 4  ;;  %s72_s22 = sshll.u32 %s2377_s1, 4  ;;  %s44_s14 = int_to_ptr.vmem [resolvable:$true] %s43_s14  ;;  %s73_s22 = int_to_ptr.vmem [resolvable:$true] %s72_s22 }
  0x20   :  { %s94_s23 = sshll.u32 %s2894_s7, 4  ;;  %s118_s5 = sshll.u32 %s2896_s9, 4  ;;  %s95_s23 = int_to_ptr.hbm [resolvable:$true] %s94_s23  ;;  %s119_s5 = int_to_ptr.hbm [resolvable:$true] %s118_s5 }
  0x21   :  { %75 = dma.hbm_to_vmem [thread:$0]  %s71_s20, 16, %s73_s22, [#allocation6]  }
  0x22   :  { %s41_s30 = sshll.u32 %s2913_s12, 4  ;;  %s2378_s27 = smov [#allocation10]   ;;  %s42_s30 = int_to_ptr.hbm [resolvable:$true] %s41_s30 }
  0x23   :  { %49 = dma.hbm_to_vmem [thread:$0]  %s42_s30, 256, %s44_s14, [#allocation3], %s2369_s24, %s2369_s24, %s2370_s25  }
  0x24   :  { %s96_s28 = sshll.u32 %s2378_s27, 4  ;;  %s2379_s4 = smov [#allocation13]   ;;  %s97_s28 = int_to_ptr.vmem [resolvable:$true] %s96_s28 }
  0x25   :  { %99 = dma.hbm_to_vmem [thread:$0]  %s95_s23, 16, %s97_s28, [#allocation9]  }
  0x26   :  { %s120_s25 = sshll.u32 %s2379_s4, 4  ;;  %s142_s12 = sshll.u32 %s2898_s11, 4  ;;  %s121_s25 = int_to_ptr.vmem [resolvable:$true] %s120_s25  ;;  %s143_s12 = int_to_ptr.hbm [resolvable:$true] %s142_s12 }
  0x27   :  { %123 = dma.hbm_to_vmem [thread:$0]  %s119_s5, 16, %s121_s25, [#allocation12]  }
  0x28   :  { %s164_s21 = sshll.u32 %s2900_s13, 4  ;;  %s2380_s0 = smov [#allocation16]   ;;  %s165_s21 = int_to_ptr.hbm [resolvable:$true] %s164_s21 }
  0x29   :  { %s144_s9 = sshll.u32 %s2380_s0, 4  ;;  %s2381_s20 = smov [#allocation19]   ;;  %s145_s9 = int_to_ptr.vmem [resolvable:$true] %s144_s9 }
  0x2a   :  { %147 = dma.hbm_to_vmem [thread:$0]  %s143_s12, 16, %s145_s9, [#allocation15]  }
  0x2b   :  { %s166_s8 = sshll.u32 %s2381_s20, 4  ;;  %s188_s22 = sshll.u32 %s2903_s16, 4  ;;  %s167_s8 = int_to_ptr.vmem [resolvable:$true] %s166_s8  ;;  %s189_s22 = int_to_ptr.hbm [resolvable:$true] %s188_s22 }
  0x2c   :  { %169 = dma.hbm_to_vmem [thread:$0]  %s165_s21, 32, %s167_s8, [#allocation18]  }
  0x2d   :  { %s201_s10 = sshll.u32 %s2905_s18, 4  ;;  %s2382_s23 = smov [#allocation22]   ;;  %s202_s10 = int_to_ptr.hbm [resolvable:$true] %s201_s10 }
  0x2e   :  { %s190_s13 = sshll.u32 %s2382_s23, 4  ;;  %s2383_s3 = smov [#allocation23]   ;;  %s191_s13 = int_to_ptr.vmem [resolvable:$true] %s190_s13 }
  0x2f   :  { %193 = dma.hbm_to_vmem [thread:$0]  %s189_s22, 16, %s191_s13, [#allocation21]  }
  0x30   :  { %s203_s26 = sshll.u32 %s2383_s3, 4  ;;  %s204_s26 = int_to_ptr.vmem [resolvable:$true] %s203_s26 }
  0x31   :  { %206 = dma.hbm_to_vmem [thread:$0]  %s202_s10, 16, %s204_s26, [#allocation24]  }
  0x32   :  { %2350 = dma.done.wait [#allocation3], 256  }
  0x33   :  { %2351 = vsyncadd [#allocation3], 4294967040 }
  0x34   :  { %2352 = dma.done.wait [#allocation6], 272  }
  0x35   :  { %2353 = vsyncadd [#allocation6], 4294967024 }
  0x36   :  { %2354 = dma.done.wait [#allocation9], 272  }
  0x37   :  { %2355 = vsyncadd [#allocation9], 4294967024 }
  0x38   :  { %2356 = dma.done.wait [#allocation12], 272  }
  0x39   :  { %2357 = vsyncadd [#allocation12], 4294967024 }
  0x3a   :  { %2358 = dma.done.wait [#allocation15], 272  }
  0x3b   :  { %2359 = vsyncadd [#allocation15], 4294967024 }
  0x3c   :  { %2360 = dma.done.wait [#allocation18], 64  }
  0x3d   :  { %2361 = vsyncadd [#allocation18], 4294967232 }
  0x3e   :  { %2362 = dma.done.wait [#allocation21], 48  }
  0x3f   :  { %2363 = vsyncadd [#allocation21], 4294967248 }
  0x40   :  { %2364 = dma.done.wait [#allocation24], 16  }
  0x41   :  { %2365 = vsyncadd [#allocation24], 4294967280  ;;  %v1826_v0 = vld [vmem:[#allocation2 + $0x8] sm:$0xff]  ;;  %v1825_v1 = vld [vmem:[#allocation2] sm:$0xff]  ;;  %s2914_s5 = sld [smem:[#allocation35_spill]]  ;;  %vm291_vm0 = vcmask 261120  }
  0x42   :  { %301 = vmatpush.bf16.msra.mxu0 %v1826_v0  ;;  %s2915_s6 = sld [smem:[#allocation38_spill]]  ;;  %s2384_s29 = smov 120   ;;  %vm316_vm1 = vcmask 64512   ;;  %vm389_vm2 = vcmask 1043456   ;;  %vm789_vm3 = vcmask 130048   ;;  %vm792_vm4 = vcmask 195584  }
  0x43   :  { %s2385_s12 = smov 88   ;;  %s2386_s7 = smov 96  }
  0x44   :  { %s2387_s30 = smov 112   ;;  %s2388_s21 = smov 80  }
  0x45   :  { %s2389_s0 = smov 72   ;;  %s2390_s9 = smov 104  }
  0x46   :  { %302 = vmatpush.bf16.msra.mxu0 %v1825_v1  ;;  %s2391_s20 = smov 56   ;;  %s2393_s8 = smov 40  }
  0x47   :  { %v264_v2 = vld [vmem:[%s2914_s5] sm:$0xff]  ;;  %v265_v3 = vld [vmem:[%s2914_s5 + $0x8] sm:$0xff]  ;;  %s2394_s14 = smov 8   ;;  %s2395_s1 = smov 16  }
  0x48   :  { %v274_v4 = vpack.c.bf16 %v265_v3, %v264_v2  ;;  %v1903_v5 = vld [vmem:[%s2915_s6] ss:$0 sm:$0xff]  ;;  %s2396_s22 = smov 24   ;;  %s2916_s10 = sld [smem:[#allocation36_spill]] }
  0x49   :  { %s1701_s11 = sshll.u32 %s2906_s19, 4  ;;  %s2399_s2 = smov 128   ;;  %s1702_s11 = int_to_ptr.hbm [resolvable:$true] %s1701_s11 }
  0x4a   :  { %1729 = vmatmul.msk.bf16.vlgmr.msra.gmra.mxu0 %vm291_vm0, %v274_v4 }
  0xc7   :  { %v304_v6 = vpop.f32.mrf.mxu0 }
  0xc8   :  { %v305_v7 = vadd.f32 %v1903_v5, %v304_v6 }
  0xca   :  { %v309_v8 = vpack.c.bf16 %v305_v7, %v305_v7 }
  0xcc   :  { %v312_v9 = vunpack.c.l.b16 %v309_v8 }
  0xce   :  { %v2567_v10 = vpack.c.b16 %v312_v9, %v312_v9 }
  0xcf   :  { %v306_v11 = vpop.f32.mrf.mxu0 }
  0xd0   :  { %v307_v12 = vadd.f32 %v1903_v5, %v306_v11  ;;  %427 = vrot.lane.b32.xlu2 %v2567_v10, %s2384_s29  ;;  %429 = vrot.lane.b32.xlu1 %v2567_v10, %s2385_s12 }
  0xd1   :  { %314 = vrot.lane.b32.xlu0 %v2567_v10, %s2386_s7 }
  0xd2   :  { %v310_v13 = vpack.c.bf16 %v307_v12, %v307_v12 }
  0xd4   :  { %v337_v14 = vunpack.c.l.b16 %v310_v13 }
  0xd6   :  { %v2575_v15 = vpack.c.b16 %v337_v14, %v337_v14 }
  0xd8   :  { %450 = vrot.lane.b32.xlu2 %v2575_v15, %s2384_s29  ;;  %452 = vrot.lane.b32.xlu1 %v2575_v15, %s2385_s12 }
  0xd9   :  { %339 = vrot.lane.b32.xlu0 %v2575_v15, %s2386_s7 }
  0xe0   :  { %539 = vrot.lane.b32.xlu2 %v2567_v10, %s2387_s30  ;;  %564 = vrot.lane.b32.xlu1 %v2575_v15, %s2388_s21 }
  0xe1   :  { %541 = vrot.lane.b32.xlu0 %v2567_v10, %s2388_s21 }
  0xe8   :  { %676 = vrot.lane.b32.xlu2 %v2575_v15, %s2389_s0  ;;  %653 = vrot.lane.b32.xlu1 %v2567_v10, %s2389_s0 }
  0xe9   :  { %562 = vrot.lane.b32.xlu0 %v2575_v15, %s2387_s30 }
  0xf0   :  { %674 = vrot.lane.b32.xlu1 %v2575_v15, %s2390_s9 }
  0xf1   :  { %651 = vrot.lane.b32.xlu0 %v2567_v10, %s2390_s9 }
 0x12a   :  { %v428_v16 = vpop.permute.xlu2 %427 }
 0x132   :  { %v451_v21 = vpop.permute.xlu2 %450 }
 0x13a   :  { %v540_v26 = vpop.permute.xlu2 %539 }
 0x142   :  { %v430_v17 = vpop.permute.xlu1 %429  ;;  %v677_v31 = vpop.permute.xlu2 %676 }
 0x143   :  { %v315_v18 = vpop.permute.xlu0 %314  ;;  %v435_v19 = vsel %vm316_vm1, %v430_v17, 0  ;;  %v682_v34 = vsel %vm316_vm1, %v677_v31, 0 }
 0x144   :  { %v321_v20 = vsel %vm316_vm1, %v315_v18, 0  ;;  %444 = vmatpush.bf16.xpose.msrb.mxu0 %v435_v19 }
 0x145   :  { %330 = vmatpush.bf16.xpose.msra.mxu1 %v321_v20 }
 0x14a   :  { %v453_v22 = vpop.permute.xlu1 %452 }
 0x14b   :  { %v340_v23 = vpop.permute.xlu0 %339  ;;  %1734 = vmatmul.msk.bf16.vlgmr.msrb.gmra.mxu0 %vm316_vm1, %v428_v16  ;;  %v458_v24 = vsel %vm316_vm1, %v453_v22, 0 }
 0x14c   :  { %1730 = vmatmul.msk.bf16.vlgmr.msra.gmra.mxu1 %vm316_vm1, %v309_v8  ;;  %v345_v25 = vsel %vm316_vm1, %v340_v23, 0 }
 0x14d   :  { %354 = vmatpush.bf16.xpose.msra.mxu2 %v345_v25  ;;  %467 = vmatpush.bf16.xpose.msrb.mxu1 %v458_v24 }
 0x152   :  { %v565_v27 = vpop.permute.xlu1 %564 }
 0x153   :  { %v570_v28 = vsel %vm316_vm1, %v565_v27, 0  ;;  %v542_v29 = vpop.permute.xlu0 %541 }
 0x154   :  { %v547_v30 = vsel %vm316_vm1, %v542_v29, 0  ;;  %1731 = vmatmul.msk.bf16.vlgmr.msra.gmra.mxu2 %vm316_vm1, %v310_v13 }
 0x155   :  { %579 = vmatpush.bf16.xpose.msra.mxu1 %v570_v28  ;;  %556 = vmatpush.bf16.xpose.msra.mxu0 %v547_v30 }
 0x15a   :  { %v654_v32 = vpop.permute.xlu1 %653 }
 0x15b   :  { %v659_v33 = vsel %vm316_vm1, %v654_v32, 0  ;;  %v563_v35 = vpop.permute.xlu0 %562 }
 0x15c   :  { %1735 = vmatmul.msk.bf16.vlgmr.msrb.gmra.mxu1 %vm316_vm1, %v451_v21  ;;  %1738 = vmatmul.msk.bf16.vlgmr.msra.gmra.mxu0 %vm316_vm1, %v540_v26 }
 0x15d   :  { %691 = vmatpush.bf16.xpose.msrb.mxu1 %v682_v34  ;;  %668 = vmatpush.bf16.xpose.msrb.mxu0 %v659_v33 }
 0x162   :  { %v675_v37 = vpop.permute.xlu1 %674 }
 0x163   :  { %v652_v36 = vpop.permute.xlu0 %651 }
 0x16c   :  { %1739 = vmatmul.msk.bf16.vlgmr.msra.gmra.mxu1 %vm316_vm1, %v563_v35  ;;  %1742 = vmatmul.msk.bf16.vlgmr.msrb.gmra.mxu0 %vm316_vm1, %v652_v36 }
 0x17c   :  { %1743 = vmatmul.msk.bf16.vlgmr.msrb.gmra.mxu1 %vm316_vm1, %v675_v37 }
 0x1c8   :  { %v446_v38 = vpop.f32.mrf.mxu0 }
 0x1c9   :  { %v332_v39 = vpop.f32.mrf.mxu1  ;;  %v473_v40 = vsel %vm316_vm1, %v446_v38, -inf }
 0x1ca   :  { %474 = vmax.xlane.f32.xlu1 %v473_v40  ;;  %v360_v41 = vsel %vm316_vm1, %v332_v39, -inf }
 0x1cb   :  { %361 = vmax.xlane.f32.xlu2 %v360_v41 }
 0x1d0   :  { %v448_v42 = vpop.f32.mrf.mxu0 }
 0x1d1   :  { %v334_v43 = vpop.f32.mrf.mxu1 }
 0x1d7   :  { %v356_v44 = vpop.f32.mrf.mxu2 }
 0x1d8   :  { %v363_v45 = vsel %vm316_vm1, %v356_v44, -inf }
 0x1d9   :  { %v469_v46 = vpop.f32.mrf.mxu1  ;;  %364 = vmax.xlane.f32.xlu0 %v363_v45  ;;  %v2618_v47 = vpop.f32.mrf.mxu0 }
 0x1da   :  { %v476_v48 = vsel %vm316_vm1, %v469_v46, -inf  ;;  %v585_v60 = vsel %vm316_vm1, %v2618_v47, -inf }
 0x1db   :  { %477 = vmax.xlane.f32.xlu2 %v476_v48 }
 0x1df   :  { %v358_v49 = vpop.f32.mrf.mxu2 }
 0x1e1   :  { %v471_v50 = vpop.f32.mrf.mxu1  ;;  %v560_v51 = vpop.f32.mrf.mxu0 }
 0x1e3   :  { %406 = vrot.lane.b32.xlu1 %v2575_v15, %s2369_s24 }
 0x1e9   :  { %v2623_v52 = vpop.f32.mrf.mxu1  ;;  %v2625_v53 = vpop.f32.mrf.mxu0 }
 0x1ea   :  { %v588_v59 = vsel %vm316_vm1, %v2623_v52, -inf  ;;  %v697_v61 = vsel %vm316_vm1, %v2625_v53, -inf }
 0x1eb   :  { %518 = vrot.lane.b32.xlu1 %v2575_v15, %s2391_s20 }
 0x1ed   :  { %497 = vrot.lane.b32.xlu0 %v2567_v10, %s2391_s20 }
 0x1f1   :  { %v583_v54 = vpop.f32.mrf.mxu1  ;;  %v672_v55 = vpop.f32.mrf.mxu0 }
 0x1f3   :  { %384 = vrot.lane.b32.xlu2 %v2567_v10, %s2369_s24  ;;  %s2392_s24 = smov 48  }
 0x1f9   :  { %v693_v56 = vpop.f32.mrf.mxu1 }
 0x1fa   :  { %v700_v58 = vsel %vm316_vm1, %v693_v56, -inf }
 0x201   :  { %v695_v57 = vpop.f32.mrf.mxu1 }
 0x215   :  { %701 = vmax.xlane.f32.xlu1 %v700_v58 }
 0x217   :  { %589 = vmax.xlane.f32.xlu0 %v588_v59 }
 0x21c   :  { %586 = vmax.xlane.f32.xlu2 %v585_v60 }
 0x21f   :  { %698 = vmax.xlane.f32.xlu0 %v697_v61 }
 0x23d   :  { %v475_v62 = vpop.xlane.xlu1 %474 }
 0x23e   :  { %v479_v63 = vsub.f32 %v446_v38, %v475_v62  ;;  %v362_v0 = vpop.xlane.xlu2 %361 }
 0x23f   :  { %v366_v1 = vsub.f32 %v332_v39, %v362_v0 }
 0x240   :  { %v481_v2 = vmul.f32 1.442695, %v479_v63 }
 0x241   :  { %v368_v3 = vmul.f32 1.442695, %v366_v1 }
 0x242   :  { %1910 = vpow2.f32 %v481_v2 }
 0x243   :  { %1912 = vpow2.f32 %v368_v3 }
 0x248   :  { %v2638_v4 = vpop.eup %1910 }
 0x249   :  { %v2640_v5 = vpop.eup %1912  ;;  %v485_v6 = vsel %vm316_vm1, %v2638_v4, 0.0 }
 0x24a   :  { %v372_v7 = vsel %vm316_vm1, %v2640_v5, 0.0  ;;  %486 = vadd.xlane.f32.xlu0 %v485_v6 }
 0x24b   :  { %373 = vadd.xlane.f32.xlu1 %v372_v7 }
 0x24c   :  { %v365_v8 = vpop.xlane.xlu0 %364 }
 0x24d   :  { %v367_v9 = vsub.f32 %v356_v44, %v365_v8 }
 0x24e   :  { %v478_v11 = vpop.xlane.xlu2 %477 }
 0x24f   :  { %v370_v12 = vmul.f32 1.442695, %v367_v9  ;;  %v480_v13 = vsub.f32 %v469_v46, %v478_v11 }
 0x251   :  { %1914 = vpow2.f32 %v370_v12  ;;  %v483_v14 = vmul.f32 1.442695, %v480_v13 }
 0x253   :  { %1916 = vpow2.f32 %v483_v14 }
 0x255   :  { %v407_v16 = vpop.permute.xlu1 %406 }
 0x256   :  { %v385_v17 = vpop.permute.xlu2 %384  ;;  %v412_v18 = vsel %vm389_vm2, %v407_v16, 0 }
 0x257   :  { %v2647_v19 = vpop.eup %1914  ;;  %v391_v20 = vsel %vm389_vm2, %v385_v17, 0 }
 0x258   :  { %400 = vmatpush.bf16.msra.mxu3 %v391_v20  ;;  %v375_v21 = vsel %vm316_vm1, %v2647_v19, 0.0 }
 0x259   :  { %v2652_v22 = vpop.eup %1916  ;;  %376 = vadd.xlane.f32.xlu0 %v375_v21 }
 0x25a   :  { %v488_v23 = vsel %vm316_vm1, %v2652_v22, 0.0 }
 0x25b   :  { %489 = vadd.xlane.f32.xlu2 %v488_v23 }
 0x25c   :  { %421 = vmatpush.bf16.msrb.mxu3 %v412_v18 }
 0x25d   :  { %v519_v26 = vpop.permute.xlu1 %518 }
 0x25e   :  { %v524_v55 = vsel %vm389_vm2, %v519_v26, 0 }
 0x25f   :  { %v498_v24 = vpop.permute.xlu0 %497 }
 0x260   :  { %v503_v25 = vsel %vm389_vm2, %v498_v24, 0 }
 0x261   :  { %512 = vmatpush.bf16.msrb.mxu2 %v503_v25 }
 0x264   :  { %630 = vrot.lane.b32.xlu1 %v2575_v15, %s2392_s24 }
 0x273   :  { %609 = vrot.lane.b32.xlu2 %v2567_v10, %s2392_s24 }
 0x288   :  { %v702_v27 = vpop.xlane.xlu1 %701 }
 0x289   :  { %v704_v28 = vsub.f32 %v693_v56, %v702_v27 }
 0x28a   :  { %v590_v29 = vpop.xlane.xlu0 %589 }
 0x28b   :  { %v592_v30 = vsub.f32 %v2623_v52, %v590_v29  ;;  %v707_v32 = vmul.f32 1.442695, %v704_v28 }
 0x28d   :  { %v595_v31 = vmul.f32 1.442695, %v592_v30 }
 0x28f   :  { %1918 = vpow2.f32 %v595_v31  ;;  %v587_v33 = vpop.xlane.xlu2 %586 }
 0x290   :  { %v591_v34 = vsub.f32 %v2618_v47, %v587_v33  ;;  %1920 = vpow2.f32 %v707_v32 }
 0x292   :  { %v593_v35 = vmul.f32 1.442695, %v591_v34  ;;  %v699_v36 = vpop.xlane.xlu0 %698 }
 0x293   :  { %v703_v37 = vsub.f32 %v2625_v53, %v699_v36 }
 0x294   :  { %1922 = vpow2.f32 %v593_v35 }
 0x295   :  { %v1919_v38 = vpop.eup %1918  ;;  %v705_v39 = vmul.f32 1.442695, %v703_v37 }
 0x296   :  { %v600_v40 = vsel %vm316_vm1, %v1919_v38, 0.0  ;;  %v2663_v41 = vpop.eup %1920 }
 0x297   :  { %1924 = vpow2.f32 %v705_v39  ;;  %601 = vadd.xlane.f32.xlu0 %v600_v40  ;;  %v712_v44 = vsel %vm316_vm1, %v2663_v41, 0.0 }
 0x29a   :  { %v1923_v42 = vpop.eup %1922 }
 0x29b   :  { %v597_v43 = vsel %vm316_vm1, %v1923_v42, 0.0 }
 0x29c   :  { %598 = vadd.xlane.f32.xlu1 %v597_v43  ;;  %713 = vadd.xlane.f32.xlu2 %v712_v44  ;;  %v1828_v43 = vld [vmem:[#allocation5 + $0x8] sm:$0xff]  ;;  %v1827_v44 = vld [vmem:[#allocation5] sm:$0xff] }
 0x29d   :  { %v1925_v45 = vpop.eup %1924  ;;  %825 = vmatpush.bf16.msra.mxu0 %v1828_v43 }
 0x29e   :  { %v709_v46 = vsel %vm316_vm1, %v1925_v45, 0.0 }
 0x29f   :  { %710 = vadd.xlane.f32.xlu0 %v709_v46  ;;  %v1831_v46 = vld [vmem:[#allocation11] sm:$0xff] }
 0x2a1   :  { %826 = vmatpush.bf16.msra.mxu0 %v1827_v44 }
 0x2b3   :  { %721 = vrot.lane.b32.xlu0 %v2567_v10, %s2393_s8 }
 0x2b5   :  { %742 = vrot.lane.b32.xlu1 %v2575_v15, %s2393_s8 }
 0x2bd   :  { %v487_v47 = vpop.xlane.xlu0 %486 }
 0x2be   :  { %v374_v48 = vpop.xlane.xlu1 %373  ;;  %1926 = vrcp.f32 %v487_v47  ;;  %v266_v47 = vld [vmem:[%s2916_s10] sm:$0xff] }
 0x2bf   :  { %1928 = vrcp.f32 %v374_v48  ;;  %v267_v48 = vld [vmem:[%s2916_s10 + $0x8] sm:$0xff] }
 0x2c4   :  { %v1927_v49 = vpop.eup %1926 }
 0x2c5   :  { %v1929_v50 = vpop.eup %1928  ;;  %v493_v51 = vmul.f32 %v1927_v49, %v2638_v4  ;;  %v935_v49 = vpack.c.bf16 %v267_v48, %v266_v47 }
 0x2c6   :  { %v380_v52 = vmul.f32 %v1929_v50, %v2640_v5 }
 0x2c7   :  { %v495_v53 = vpack.c.bf16 %v493_v51, %v493_v51  ;;  %v268_v51 = vld [vmem:[%s2916_s10 + $0x10] sm:$0xff] }
 0x2c8   :  { %v382_v54 = vpack.c.bf16 %v380_v52, %v380_v52  ;;  %v269_v52 = vld [vmem:[%s2916_s10 + $0x18] sm:$0xff] }
 0x2c9   :  { %1736 = vmatmul.msk.bf16.vlgmr.msrb.gmra.mxu2 %vm316_vm1, %v495_v53 }
 0x2ca   :  { %1732 = vmatmul.msk.bf16.vlgmr.msra.gmra.mxu3 %vm316_vm1, %v382_v54  ;;  %v936_v54 = vpack.c.bf16 %v269_v52, %v268_v51 }
 0x2cb   :  { %533 = vmatpush.bf16.msra.mxu3 %v524_v55 }
 0x2cc   :  { %v377_v10 = vpop.xlane.xlu0 %376 }
 0x2cd   :  { %1930 = vrcp.f32 %v377_v10 }
 0x2ce   :  { %v490_v15 = vpop.xlane.xlu2 %489 }
 0x2cf   :  { %1932 = vrcp.f32 %v490_v15 }
 0x2d3   :  { %v1931_v56 = vpop.eup %1930 }
 0x2d4   :  { %v381_v57 = vmul.f32 %v1931_v56, %v2647_v19 }
 0x2d5   :  { %v1933_v63 = vpop.eup %1932 }
 0x2d6   :  { %v610_v58 = vpop.permute.xlu2 %609  ;;  %v631_v60 = vpop.permute.xlu1 %630  ;;  %v383_v61 = vpack.c.bf16 %v381_v57, %v381_v57  ;;  %v494_v0 = vmul.f32 %v1933_v63, %v2652_v22 }
 0x2d7   :  { %v615_v59 = vsel %vm389_vm2, %v610_v58, 0  ;;  %v636_v62 = vsel %vm389_vm2, %v631_v60, 0 }
 0x2d8   :  { %624 = vmatpush.bf16.msra.mxu2 %v615_v59  ;;  %v496_v1 = vpack.c.bf16 %v494_v0, %v494_v0 }
 0x2da   :  { %1733 = vmatmul.msk.bf16.vlgmr.msrb.gmra.mxu3 %vm316_vm1, %v383_v61 }
 0x2db   :  { %645 = vmatpush.bf16.msrb.mxu3 %v636_v62 }
 0x2ea   :  { %1737 = vmatmul.msk.bf16.vlgmr.msra.gmra.mxu3 %vm316_vm1, %v496_v1 }
 0x30a   :  { %v602_v2 = vpop.xlane.xlu0 %601 }
 0x30b   :  { %1934 = vrcp.f32 %v602_v2 }
 0x30f   :  { %v599_v3 = vpop.xlane.xlu1 %598  ;;  %v714_v9 = vpop.xlane.xlu2 %713 }
 0x310   :  { %1936 = vrcp.f32 %v599_v3  ;;  %v1830_v3 = vld [vmem:[#allocation8 + $0x8] sm:$0xff] }
 0x311   :  { %v1935_v4 = vpop.eup %1934  ;;  %1938 = vrcp.f32 %v714_v9  ;;  %923 = vmatpush.bf16.msra.mxu1 %v1830_v3 }
 0x312   :  { %v606_v5 = vmul.f32 %v1935_v4, %v1919_v38  ;;  %v711_v12 = vpop.xlane.xlu0 %710  ;;  %v1829_v4 = vld [vmem:[#allocation8] sm:$0xff] }
 0x313   :  { %1940 = vrcp.f32 %v711_v12 }
 0x314   :  { %v608_v6 = vpack.c.bf16 %v606_v5, %v606_v5  ;;  %v1905_v5 = vld [vmem:[#allocation13] ss:$0 sm:$0xff] }
 0x315   :  { %924 = vmatpush.bf16.msra.mxu1 %v1829_v4 }
 0x316   :  { %1741 = vmatmul.msk.bf16.vlgmr.msrb.gmra.mxu3 %vm316_vm1, %v608_v6  ;;  %v1937_v7 = vpop.eup %1936 }
 0x317   :  { %v605_v8 = vmul.f32 %v1937_v7, %v1923_v42  ;;  %v1939_v13 = vpop.eup %1938 }
 0x318   :  { %v718_v17 = vmul.f32 %v1939_v13, %v2663_v41 }
 0x319   :  { %v607_v11 = vpack.c.bf16 %v605_v8, %v605_v8  ;;  %v1941_v14 = vpop.eup %1940 }
 0x31a   :  { %v717_v18 = vmul.f32 %v1941_v14, %v1925_v45  ;;  %v720_v22 = vpack.c.bf16 %v718_v17, %v718_v17  ;;  %v1832_v45 = vld [vmem:[#allocation11 + $0x8] sm:$0xff] }
 0x31b   :  { %1740 = vmatmul.msk.bf16.vlgmr.msra.gmra.mxu2 %vm316_vm1, %v607_v11 }
 0x31c   :  { %v719_v23 = vpack.c.bf16 %v717_v18, %v717_v18 }
 0x325   :  { %v722_v16 = vpop.permute.xlu0 %721 }
 0x326   :  { %v727_v19 = vsel %vm389_vm2, %v722_v16, 0 }
 0x327   :  { %v743_v20 = vpop.permute.xlu1 %742  ;;  %736 = vmatpush.bf16.msrb.mxu2 %v727_v19 }
 0x328   :  { %v748_v21 = vsel %vm389_vm2, %v743_v20, 0 }
 0x329   :  { %757 = vmatpush.bf16.msra.mxu3 %v748_v21  ;;  %v1904_v21 = vld [vmem:[#allocation7] ss:$0 sm:$0xff] }
 0x32b   :  { %1744 = vmatmul.msk.bf16.vlgmr.msrb.gmra.mxu2 %vm316_vm1, %v719_v23 }
 0x32c   :  { %1745 = vmatmul.msk.bf16.vlgmr.msra.gmra.mxu3 %vm316_vm1, %v720_v22  ;;  %965 = vmatpush.bf16.msra.mxu2 %v1832_v45 }
 0x330   :  { %966 = vmatpush.bf16.msra.mxu2 %v1831_v46 }
 0x33b   :  { %1772 = vmatmul.msk.bf16.vlgmr.msra.gmra.mxu2 %vm291_vm0, %v935_v49 }
 0x34b   :  { %1773 = vmatmul.msk.bf16.gmra.mxu2 %vm291_vm0, %v936_v54 }
 0x34c   :  { %v514_v24 = vpop.f32.mrf.mxu2 }
 0x34d   :  { %v402_v25 = vpop.f32.mrf.mxu3 }
 0x354   :  { %v516_v26 = vpop.f32.mrf.mxu2 }
 0x355   :  { %v404_v27 = vpop.f32.mrf.mxu3 }
 0x35d   :  { %v423_v28 = vpop.f32.mrf.mxu3 }
 0x365   :  { %v425_v29 = vpop.f32.mrf.mxu3 }
 0x36d   :  { %v535_v30 = vpop.f32.mrf.mxu3 }
 0x36e   :  { %v1873_v31 = vpack.i.bf16 %v535_v30, %v514_v24 }
 0x370   :  { %1874 = vrot.lane.b32.xlu0 %v1873_v31, %s2394_s14 }
 0x375   :  { %v537_v32 = vpop.f32.mrf.mxu3 }
 0x399   :  { %v647_v33 = vpop.f32.mrf.mxu3 }
 0x39e   :  { %v626_v34 = vpop.f32.mrf.mxu2 }
 0x39f   :  { %v1878_v35 = vpack.i.bf16 %v647_v33, %v626_v34  ;;  %v1906_v34 = vld [vmem:[#allocation10] ss:$0 sm:$0xff] }
 0x3a1   :  { %v649_v36 = vpop.f32.mrf.mxu3  ;;  %1879 = vrot.lane.b32.xlu1 %v1878_v35, %s2395_s1 }
 0x3a6   :  { %v628_v37 = vpop.f32.mrf.mxu2 }
 0x3ae   :  { %v738_v38 = vpop.f32.mrf.mxu2 }
 0x3af   :  { %v759_v39 = vpop.f32.mrf.mxu3 }
 0x3b0   :  { %v1883_v40 = vpack.i.bf16 %v759_v39, %v738_v38 }
 0x3b2   :  { %1884 = vrot.lane.b32.xlu0 %v1883_v40, %s2396_s22 }
 0x3b6   :  { %v740_v41 = vpop.f32.mrf.mxu2 }
 0x3b7   :  { %v761_v42 = vpop.f32.mrf.mxu3 }
 0x3be   :  { %v968_v6 = vpop.f32.mrf.mxu2 }
 0x3bf   :  { %v969_v7 = vadd.f32 %v1905_v5, %v968_v6 }
 0x3c1   :  { %v980_v8 = vpack.c.bf16 %v969_v7, %v969_v7 }
 0x3c3   :  { %v986_v12 = vunpack.c.l.b16 %v980_v8 }
 0x3c6   :  { %v970_v9 = vpop.f32.mrf.mxu2 }
 0x3c7   :  { %v971_v11 = vadd.f32 %v1905_v5, %v970_v9 }
 0x3c9   :  { %v981_v13 = vpack.c.bf16 %v971_v11, %v971_v11 }
 0x3cb   :  { %v987_v14 = vunpack.c.l.b16 %v981_v13 }
 0x3cd   :  { %v2713_v16 = vpack.c.b16 %v987_v14, %v986_v12 }
 0x3ce   :  { %v973_v17 = vpop.f32.mrf.mxu2 }
 0x3cf   :  { %1099 = vrot.lane.b32.xlu2 %v2713_v16, %s2384_s29  ;;  %1056 = vrot.lane.b32.xlu0 %v2713_v16, %s2386_s7  ;;  %v993_v19 = vsel %vm316_vm1, %v2713_v16, 0  ;;  %v974_v20 = vadd.f32 %v1905_v5, %v973_v17 }
 0x3d0   :  { %1002 = vmatpush.bf16.xpose.msrb.mxu3 %v993_v19 }
 0x3d1   :  { %v982_v22 = vpack.c.bf16 %v974_v20, %v974_v20 }
 0x3d6   :  { %v975_v23 = vpop.f32.mrf.mxu2 }
 0x3e2   :  { %v1875_v50 = vpop.permute.xlu0 %1874 }
 0x3e3   :  { %v1877_v55 = vunpack.i.h.bf16 %v1875_v50  ;;  %v1876_v10 = vunpack.i.l.bf16 %v1875_v50 }
 0x3e5   :  { %v788_v58 = vsel %vm316_vm1, %v423_v28, %v1877_v55  ;;  %v787_v59 = vsel %vm316_vm1, %v402_v25, %v1876_v10  ;;  %v976_v25 = vadd.f32 %v1905_v5, %v975_v23  ;;  %v1010_v28 = vunpack.c.l.b16 %v982_v22 }
 0x3e7   :  { %v983_v29 = vpack.c.bf16 %v976_v25, %v976_v25 }
 0x3e9   :  { %v1011_v31 = vunpack.c.l.b16 %v983_v29 }
 0x3eb   :  { %v2728_v32 = vpack.c.b16 %v1011_v31, %v1010_v28 }
 0x3ed   :  { %1125 = vrot.lane.b32.xlu0 %v2728_v32, %s2384_s29  ;;  %v1017_v33 = vsel %vm316_vm1, %v2728_v32, 0 }
 0x3ee   :  { %1026 = vmatpush.bf16.xpose.msrb.mxu0 %v1017_v33 }
 0x413   :  { %v1880_v53 = vpop.permute.xlu1 %1879 }
 0x414   :  { %v1882_v15 = vunpack.i.h.bf16 %v1880_v53  ;;  %v1881_v56 = vunpack.i.l.bf16 %v1880_v53 }
 0x416   :  { %v790_v62 = vsel %vm789_vm3, %v787_v59, %v1881_v56  ;;  %v791_v63 = vsel %vm789_vm3, %v788_v58, %v1882_v15 }
 0x424   :  { %v1885_v57 = vpop.permute.xlu0 %1884 }
 0x425   :  { %v1887_v60 = vunpack.i.h.bf16 %v1885_v57  ;;  %v1886_v61 = vunpack.i.l.bf16 %v1885_v57 }
 0x427   :  { %v793_v0 = vsel %vm792_vm4, %v790_v62, %v1886_v61  ;;  %v794_v1 = vsel %vm792_vm4, %v791_v63, %v1887_v60 }
 0x428   :  { %v799_v2 = vpack.c.bf16 %v794_v1, %v793_v0 }
 0x429   :  { %v1100_v42 = vpop.permute.xlu2 %1099 }
 0x42a   :  { %1754 = vmatmul.msk.bf16.vlgmr.msra.gmra.mxu0 %vm291_vm0, %v799_v2  ;;  %v1105_v44 = vsel %vm316_vm1, %v1100_v42, 0 }
 0x42b   :  { %1114 = vmatpush.bf16.xpose.msra.mxu0 %v1105_v44 }
 0x441   :  { %v1057_v43 = vpop.permute.xlu0 %1056 }
 0x442   :  { %1069 = vmatpush.bf16.msrb.mxu1 %v1057_v43 }
 0x45f   :  { %v1126_v48 = vpop.permute.xlu0 %1125 }
 0x460   :  { %v1131_v49 = vsel %vm316_vm1, %v1126_v48, 0 }
 0x4a7   :  { %v828_v18 = vpop.f32.mrf.mxu0 }
 0x4a8   :  { %v2721_v26 = vadd.f32 %v1904_v21, %v828_v18 }
 0x4af   :  { %v830_v24 = vpop.f32.mrf.mxu0 }
 0x4b0   :  { %v2723_v27 = vadd.f32 %v1904_v21, %v830_v24 }
 0x4b2   :  { %v897_v30 = vpack.c.bf16 %v2723_v27, %v2721_v26 }
 0x4b4   :  { %1763 = vmatmul.msk.bf16.vlgmr.msra.gmra.mxu1 %vm291_vm0, %v897_v30 }
 0x4b5   :  { %1140 = vmatpush.bf16.xpose.msra.mxu1 %v1131_v49 }
 0x531   :  { %v926_v35 = vpop.f32.mrf.mxu1 }
 0x532   :  { %v927_v36 = vadd.f32 %v1906_v34, %v926_v35 }
 0x534   :  { %v978_v37 = vpack.c.bf16 %v927_v36, %v927_v36 }
 0x536   :  { %v1095_v38 = vunpack.c.l.b16 %v978_v37  ;;  %1774 = vmatmul.msk.bf16.vlgmr.msrb.gmra.mxu3 %vm316_vm1, %v978_v37 }
 0x538   :  { %v1096_v39 = vpack.c.b16 %v1095_v38, %v1095_v38 }
 0x539   :  { %v928_v40 = vpop.f32.mrf.mxu1 }
 0x53a   :  { %v929_v41 = vadd.f32 %v1906_v34, %v928_v40  ;;  %1097 = vrot.lane.b32.xlu0 %v1096_v39, %s2384_s29 }
 0x53c   :  { %v979_v45 = vpack.c.bf16 %v929_v41, %v929_v41 }
 0x53e   :  { %v1121_v46 = vunpack.c.l.b16 %v979_v45  ;;  %1775 = vmatmul.msk.bf16.vlgmr.msrb.gmra.mxu0 %vm316_vm1, %v979_v45 }
 0x540   :  { %v1122_v47 = vpack.c.b16 %v1121_v46, %v1121_v46 }
 0x542   :  { %1123 = vrot.lane.b32.xlu0 %v1122_v47, %s2384_s29 }
 0x54a   :  { %1233 = vrot.lane.b32.xlu0 %v2728_v32, %s2387_s30 }
 0x552   :  { %1318 = vrot.lane.b32.xlu0 %v2713_v16, %s2390_s9 }
 0x55a   :  { %1316 = vrot.lane.b32.xlu0 %v1096_v39, %s2390_s9 }
 0x5ac   :  { %v1098_v50 = vpop.permute.xlu0 %1097 }
 0x5ad   :  { %1778 = vmatmul.msk.bf16.vlgmr.msra.gmra.mxu0 %vm316_vm1, %v1098_v50 }
 0x5b4   :  { %v1124_v15 = vpop.permute.xlu0 %1123 }
 0x5b9   :  { %v1004_v51 = vpop.f32.mrf.mxu3 }
 0x5ba   :  { %v1032_v52 = vsel %vm789_vm3, %v1004_v51, -inf }
 0x5bb   :  { %v1028_v53 = vpop.f32.mrf.mxu0  ;;  %1033 = vmax.xlane.f32.xlu1 %v1032_v52 }
 0x5bc   :  { %v1035_v54 = vsel %vm789_vm3, %v1028_v53, -inf  ;;  %v1234_v56 = vpop.permute.xlu0 %1233 }
 0x5bd   :  { %1036 = vmax.xlane.f32.xlu0 %v1035_v54  ;;  %v1239_v18 = vsel %vm316_vm1, %v1234_v56, 0 }
 0x5c1   :  { %v1006_v55 = vpop.f32.mrf.mxu3 }
 0x5c3   :  { %v1030_v10 = vpop.f32.mrf.mxu0 }
 0x5c4   :  { %v1319_v57 = vpop.permute.xlu0 %1318 }
 0x5c5   :  { %v1324_v14 = vsel %vm316_vm1, %v1319_v57, 0 }
 0x5cc   :  { %v1317_v58 = vpop.permute.xlu0 %1316 }
 0x5d4   :  { %1208 = vrot.lane.b32.xlu1 %v1096_v39, %s2387_s30 }
 0x62a   :  { %v1116_v59 = vpop.f32.mrf.mxu0 }
 0x62b   :  { %v1146_v60 = vsel %vm789_vm3, %v1116_v59, -inf }
 0x62c   :  { %1147 = vmax.xlane.f32.xlu1 %v1146_v60 }
 0x62e   :  { %v1034_v61 = vpop.xlane.xlu1 %1033 }
 0x62f   :  { %v1038_v62 = vsub.f32 %v1004_v51, %v1034_v61 }
 0x630   :  { %v1037_v63 = vpop.xlane.xlu0 %1036 }
 0x631   :  { %v1040_v0 = vmul.f32 1.442695, %v1038_v62  ;;  %v1039_v1 = vsub.f32 %v1028_v53, %v1037_v63 }
 0x632   :  { %v1118_v2 = vpop.f32.mrf.mxu0 }
 0x633   :  { %1942 = vpow2.f32 %v1040_v0  ;;  %v1042_v3 = vmul.f32 1.442695, %v1039_v1 }
 0x635   :  { %1944 = vpow2.f32 %v1042_v3 }
 0x639   :  { %v1943_v4 = vpop.eup %1942 }
 0x63a   :  { %v1044_v5 = vsel %vm789_vm3, %v1943_v4, 0.0 }
 0x63b   :  { %v2751_v6 = vpop.eup %1944  ;;  %1045 = vadd.xlane.f32.xlu2 %v1044_v5 }
 0x63c   :  { %v1047_v7 = vsel %vm789_vm3, %v2751_v6, 0.0 }
 0x63d   :  { %1048 = vadd.xlane.f32.xlu1 %v1047_v7 }
 0x646   :  { %v1209_v19 = vpop.permute.xlu1 %1208 }
 0x653   :  { %1210 = vrot.lane.b32.xlu2 %v2713_v16, %s2387_s30 }
 0x65b   :  { %1231 = vrot.lane.b32.xlu2 %v1122_v47, %s2387_s30 }
 0x663   :  { %1341 = vrot.lane.b32.xlu2 %v2728_v32, %s2390_s9 }
 0x66b   :  { %1339 = vrot.lane.b32.xlu2 %v1122_v47, %s2390_s9 }
 0x69f   :  { %v1148_v24 = vpop.xlane.xlu1 %1147 }
 0x6a0   :  { %v1152_v25 = vsub.f32 %v1116_v59, %v1148_v24 }
 0x6a2   :  { %v1154_v29 = vmul.f32 1.442695, %v1152_v25 }
 0x6ae   :  { %v1046_v8 = vpop.xlane.xlu2 %1045 }
 0x6af   :  { %1946 = vrcp.f32 %v1046_v8 }
 0x6b0   :  { %1948 = vpow2.f32 %v1154_v29  ;;  %v1049_v55 = vpop.xlane.xlu1 %1048 }
 0x6b5   :  { %v1947_v9 = vpop.eup %1946 }
 0x6b6   :  { %v1052_v11 = vmul.f32 %v1947_v9, %v1943_v4  ;;  %v1211_v12 = vpop.permute.xlu2 %1210  ;;  %v2774_v34 = vpop.eup %1948 }
 0x6b7   :  { %v1216_v13 = vsel %vm316_vm1, %v1211_v12, 0  ;;  %v1158_v36 = vsel %vm789_vm3, %v2774_v34, 0.0 }
 0x6b8   :  { %v1054_v17 = vpack.c.bf16 %v1052_v11, %v1052_v11  ;;  %1225 = vmatpush.bf16.xpose.msrb.mxu0 %v1216_v13 }
 0x6ba   :  { %1776 = vmatmul.msk.bf16.vlgmr.msrb.gmra.mxu1 %vm789_vm3, %v1054_v17 }
 0x6bb   :  { %1248 = vmatpush.bf16.xpose.msrb.mxu1 %v1239_v18 }
 0x6be   :  { %v1232_v20 = vpop.permute.xlu2 %1231 }
 0x6bf   :  { %1782 = vmatmul.msk.bf16.vlgmr.msrb.gmra.mxu0 %vm316_vm1, %v1209_v19 }
 0x6c0   :  { %1333 = vmatpush.bf16.xpose.msra.mxu0 %v1324_v14 }
 0x6c6   :  { %v1342_v21 = vpop.permute.xlu2 %1341 }
 0x6c7   :  { %v1347_v22 = vsel %vm316_vm1, %v1342_v21, 0 }
 0x6ca   :  { %1779 = vmatmul.msk.bf16.vlgmr.msra.gmra.mxu1 %vm316_vm1, %v1124_v15 }
 0x6cb   :  { %1356 = vmatpush.bf16.xpose.msra.mxu1 %v1347_v22 }
 0x6ce   :  { %v1340_v23 = vpop.permute.xlu2 %1339 }
 0x6cf   :  { %1786 = vmatmul.msk.bf16.vlgmr.msra.gmra.mxu0 %vm316_vm1, %v1317_v58 }
 0x6da   :  { %1783 = vmatmul.msk.bf16.vlgmr.msrb.gmra.mxu1 %vm316_vm1, %v1232_v20 }
 0x6ea   :  { %1787 = vmatmul.msk.bf16.vlgmr.msra.gmra.mxu1 %vm316_vm1, %v1340_v23 }
 0x737   :  { %v2771_v28 = vpop.f32.mrf.mxu1 }
 0x73c   :  { %v1227_v30 = vpop.f32.mrf.mxu0 }
 0x73d   :  { %v1254_v31 = vsel %vm789_vm3, %v1227_v30, -inf }
 0x73e   :  { %1255 = vmax.xlane.f32.xlu0 %v1254_v31 }
 0x73f   :  { %v1073_v33 = vpop.f32.mrf.mxu1 }
 0x744   :  { %v1229_v35 = vpop.f32.mrf.mxu0 }
 0x746   :  { %1159 = vadd.xlane.f32.xlu0 %v1158_v36 }
 0x747   :  { %v1142_v37 = vpop.f32.mrf.mxu1 }
 0x748   :  { %v1149_v42 = vsel %vm789_vm3, %v1142_v37, -inf }
 0x74c   :  { %v2778_v38 = vpop.f32.mrf.mxu0 }
 0x74d   :  { %v1362_v39 = vsel %vm789_vm3, %v2778_v38, -inf }
 0x74e   :  { %1363 = vmax.xlane.f32.xlu2 %v1362_v39 }
 0x74f   :  { %v1144_v40 = vpop.f32.mrf.mxu1 }
 0x754   :  { %v1337_v41 = vpop.f32.mrf.mxu0 }
 0x756   :  { %1150 = vmax.xlane.f32.xlu2 %v1149_v42 }
 0x757   :  { %v1250_v43 = vpop.f32.mrf.mxu1 }
 0x758   :  { %v1257_v44 = vsel %vm789_vm3, %v1250_v43, -inf }
 0x759   :  { %1258 = vmax.xlane.f32.xlu1 %v1257_v44 }
 0x75f   :  { %v1252_v45 = vpop.f32.mrf.mxu1 }
 0x767   :  { %v1358_v46 = vpop.f32.mrf.mxu1 }
 0x768   :  { %v1365_v47 = vsel %vm789_vm3, %v1358_v46, -inf }
 0x769   :  { %1366 = vmax.xlane.f32.xlu0 %v1365_v47 }
 0x76e   :  { %1075 = vrot.lane.b32.xlu2 %v2728_v32, %s2386_s7 }
 0x76f   :  { %v1360_v48 = vpop.f32.mrf.mxu1 }
 0x772   :  { %1189 = vrot.lane.b32.xlu1 %v2728_v32, %s2385_s12 }
 0x77a   :  { %1278 = vrot.lane.b32.xlu1 %v2713_v16, %s2388_s21 }
 0x77d   :  { %1170 = vrot.lane.b32.xlu0 %v2713_v16, %s2385_s12 }
 0x7b1   :  { %v1256_v49 = vpop.xlane.xlu0 %1255 }
 0x7b2   :  { %v1260_v50 = vsub.f32 %v1227_v30, %v1256_v49 }
 0x7b4   :  { %v1262_v51 = vmul.f32 1.442695, %v1260_v50 }
 0x7b6   :  { %1950 = vpow2.f32 %v1262_v51 }
 0x7b7   :  { %1952 = vrcp.f32 %v1049_v55 }
 0x7b9   :  { %v1160_v1 = vpop.xlane.xlu0 %1159 }
 0x7bc   :  { %v1951_v52 = vpop.eup %1950 }
 0x7bd   :  { %v1266_v53 = vsel %vm789_vm3, %v1951_v52, 0.0  ;;  %v1953_v56 = vpop.eup %1952 }
 0x7be   :  { %1267 = vadd.xlane.f32.xlu2 %v1266_v53  ;;  %v1053_v60 = vmul.f32 %v1953_v56, %v2751_v6 }
 0x7c0   :  { %v1055_v63 = vpack.c.bf16 %v1053_v60, %v1053_v60  ;;  %v1988_v60 = vld [vmem:[%s2914_s5] sm:$0xff] }
 0x7c1   :  { %v1364_v54 = vpop.xlane.xlu2 %1363 }
 0x7c2   :  { %v1368_v19 = vsub.f32 %v2778_v38, %v1364_v54 }
 0x7c4   :  { %v1370_v20 = vmul.f32 1.442695, %v1368_v19 }
 0x7c9   :  { %v1151_v10 = vpop.xlane.xlu2 %1150 }
 0x7ca   :  { %v1153_v15 = vsub.f32 %v1142_v37, %v1151_v10 }
 0x7cc   :  { %v1156_v57 = vmul.f32 1.442695, %v1153_v15  ;;  %v1259_v58 = vpop.xlane.xlu1 %1258 }
 0x7cd   :  { %v1261_v59 = vsub.f32 %v1250_v43, %v1259_v58 }
 0x7ce   :  { %1954 = vpow2.f32 %v1156_v57 }
 0x7cf   :  { %v1264_v61 = vmul.f32 1.442695, %v1261_v59 }
 0x7d1   :  { %1956 = vpow2.f32 %v1264_v61  ;;  %v1076_v62 = vpop.permute.xlu2 %1075  ;;  %v833_v61 = vadd.f32 %v1988_v60, %v2721_v26 }
 0x7d2   :  { %1088 = vmatpush.bf16.msra.mxu3 %v1076_v62 }
 0x7d3   :  { %v836_v62 = vsel %vm291_vm0, %v833_v61, 0.0 }
 0x7d4   :  { %v1955_v0 = vpop.eup %1954 }
 0x7d5   :  { %1777 = vmatmul.msk.bf16.vlgmr.msra.gmra.mxu3 %vm789_vm3, %v1055_v63  ;;  %v1161_v2 = vsel %vm789_vm3, %v1955_v0, 0.0  ;;  %v1989_v63 = vld [vmem:[%s2914_s5 + $0x8] sm:$0xff] }
 0x7d6   :  { %1162 = vadd.xlane.f32.xlu1 %v1161_v2 }
 0x7d7   :  { %v1957_v3 = vpop.eup %1956 }
 0x7d8   :  { %v1269_v4 = vsel %vm789_vm3, %v1957_v3, 0.0 }
 0x7d9   :  { %1270 = vadd.xlane.f32.xlu0 %v1269_v4 }
 0x7dc   :  { %v1367_v5 = vpop.xlane.xlu0 %1366 }
 0x7dd   :  { %v1369_v7 = vsub.f32 %v1358_v46, %v1367_v5  ;;  %v2397_v5 = vmov 32.0  }
 0x7df   :  { %v1372_v8 = vmul.f32 1.442695, %v1369_v7 }
 0x7e1   :  { %1958 = vpow2.f32 %v1372_v8 }
 0x7e2   :  { %1960 = vrcp.f32 %v1160_v1 }
 0x7e3   :  { %1962 = vpow2.f32 %v1370_v20 }
 0x7e4   :  { %v1190_v6 = vpop.permute.xlu1 %1189 }
 0x7e5   :  { %1202 = vmatpush.bf16.msrb.mxu3 %v1190_v6  ;;  %v1834_v6 = vld [vmem:[#allocation14 + $0x8] sm:$0xff] }
 0x7e6   :  { %1484 = vmatpush.bf16.msrb.mxu0 %v1834_v6 }
 0x7e7   :  { %v1959_v9 = vpop.eup %1958 }
 0x7e8   :  { %v1377_v11 = vsel %vm789_vm3, %v1959_v9, 0.0  ;;  %v1961_v12 = vpop.eup %1960 }
 0x7e9   :  { %1378 = vadd.xlane.f32.xlu2 %v1377_v11  ;;  %v1166_v13 = vmul.f32 %v1961_v12, %v2774_v34  ;;  %v1963_v21 = vpop.eup %1962 }
 0x7eb   :  { %v1168_v18 = vpack.c.bf16 %v1166_v13, %v1166_v13  ;;  %v1833_v13 = vld [vmem:[#allocation14] sm:$0xff] }
 0x7ec   :  { %v1279_v17 = vpop.permute.xlu1 %1278  ;;  %1485 = vmatpush.bf16.msrb.mxu0 %v1833_v13 }
 0x7ed   :  { %1386 = vrot.lane.b32.xlu0 %v2713_v16, %s2389_s0  ;;  %v1374_v16 = vsel %vm789_vm3, %v1963_v21, 0.0 }
 0x7ef   :  { %1297 = vrot.lane.b32.xlu1 %v2728_v32, %s2388_s21  ;;  %v1171_v14 = vpop.permute.xlu0 %1170 }
 0x7f0   :  { %1183 = vmatpush.bf16.msrb.mxu2 %v1171_v14 }
 0x7f3   :  { %1780 = vmatmul.msk.bf16.vlgmr.msrb.gmra.mxu2 %vm789_vm3, %v1168_v18 }
 0x7f4   :  { %1291 = vmatpush.bf16.msra.mxu2 %v1279_v17 }
 0x801   :  { %1405 = vrot.lane.b32.xlu2 %v2728_v32, %s2389_s0 }
 0x819   :  { %1375 = vadd.xlane.f32.xlu1 %v1374_v16 }
 0x831   :  { %v1268_v22 = vpop.xlane.xlu2 %1267 }
 0x832   :  { %1964 = vrcp.f32 %v1268_v22 }
 0x838   :  { %v1965_v23 = vpop.eup %1964 }
 0x839   :  { %v1274_v24 = vmul.f32 %v1965_v23, %v1951_v52 }
 0x83b   :  { %v1276_v25 = vpack.c.bf16 %v1274_v24, %v1274_v24 }
 0x83d   :  { %1784 = vmatmul.msk.bf16.vlgmr.msra.gmra.mxu2 %vm789_vm3, %v1276_v25 }
 0x849   :  { %v1163_v29 = vpop.xlane.xlu1 %1162 }
 0x84a   :  { %1966 = vrcp.f32 %v1163_v29 }
 0x84c   :  { %v1271_v33 = vpop.xlane.xlu0 %1270 }
 0x84d   :  { %1968 = vrcp.f32 %v1271_v33 }
 0x850   :  { %v1967_v30 = vpop.eup %1966 }
 0x851   :  { %v1167_v31 = vmul.f32 %v1967_v30, %v1955_v0  ;;  %v834_v0 = vadd.f32 %v1989_v63, %v2723_v27 }
 0x853   :  { %v1169_v32 = vpack.c.bf16 %v1167_v31, %v1167_v31  ;;  %v1969_v35 = vpop.eup %1968  ;;  %v839_v1 = vsel %vm291_vm0, %v834_v0, 0.0 }
 0x854   :  { %v1275_v37 = vmul.f32 %v1969_v35, %v1957_v3 }
 0x855   :  { %1781 = vmatmul.msk.bf16.vlgmr.msrb.gmra.mxu3 %vm789_vm3, %v1169_v32 }
 0x856   :  { %v1277_v41 = vpack.c.bf16 %v1275_v37, %v1275_v37 }
 0x858   :  { %v2811_v34 = vpop.f32.mrf.mxu3 }
 0x85c   :  { %v1379_v36 = vpop.xlane.xlu2 %1378 }
 0x85d   :  { %1970 = vrcp.f32 %v1379_v36 }
 0x85f   :  { %v1387_v38 = vpop.permute.xlu0 %1386 }
 0x860   :  { %v1092_v39 = vpop.f32.mrf.mxu3  ;;  %1399 = vmatpush.bf16.msrb.mxu2 %v1387_v38 }
 0x861   :  { %v1298_v40 = vpop.permute.xlu1 %1297 }
 0x862   :  { %1310 = vmatpush.bf16.msra.mxu3 %v1298_v40 }
 0x863   :  { %v1971_v43 = vpop.eup %1970 }
 0x864   :  { %v1406_v42 = vpop.permute.xlu2 %1405  ;;  %v1383_v44 = vmul.f32 %v1971_v43, %v1959_v9 }
 0x865   :  { %1785 = vmatmul.msk.bf16.vlgmr.msra.gmra.mxu3 %vm789_vm3, %v1277_v41 }
 0x866   :  { %1418 = vmatpush.bf16.msrb.mxu3 %v1406_v42  ;;  %v1385_v45 = vpack.c.bf16 %v1383_v44, %v1383_v44 }
 0x875   :  { %1789 = vmatmul.msk.bf16.vlgmr.msrb.gmra.mxu3 %vm789_vm3, %v1385_v45 }
 0x876   :  { %v1185_v46 = vpop.f32.mrf.mxu2 }
 0x87e   :  { %v1187_v47 = vpop.f32.mrf.mxu2 }
 0x88c   :  { %v1376_v48 = vpop.xlane.xlu1 %1375 }
 0x88d   :  { %1972 = vrcp.f32 %v1376_v48 }
 0x88e   :  { %1974 = vrcp.f32 %v2397_v5 }
 0x893   :  { %v1973_v49 = vpop.eup %1972 }
 0x894   :  { %v1382_v50 = vmul.f32 %v1973_v49, %v1963_v21  ;;  %v1975_v26 = vpop.eup %1974 }
 0x895   :  { %v843_v7 = vmul.f32 32.0, %v1975_v26  ;;  %vm847_vm5 = vweird.f32 %v1975_v26 }
 0x896   :  { %v1384_v51 = vpack.c.bf16 %v1382_v50, %v1382_v50 }
 0x897   :  { %v844_v8 = vsub.f32 1.0, %v843_v7 }
 0x898   :  { %1788 = vmatmul.msk.bf16.vlgmr.msrb.gmra.mxu2 %vm789_vm3, %v1384_v51 }
 0x899   :  { %v845_v9 = vmul.f32 %v1975_v26, %v844_v8 }
 0x89b   :  { %v846_v12 = vadd.f32 %v1975_v26, %v845_v9 }
 0x89d   :  { %v2829_v27 = vsel %vm847_vm5, %v1975_v26, %v846_v12 }
 0x8c0   :  { %v1293_v52 = vpop.f32.mrf.mxu2 }
 0x8c8   :  { %v1295_v53 = vpop.f32.mrf.mxu2 }
 0x8d8   :  { %v1204_v54 = vpop.f32.mrf.mxu3 }
 0x8d9   :  { %v1888_v55 = vpack.i.bf16 %v1204_v54, %v1185_v46 }
 0x8db   :  { %1889 = vrot.lane.b32.xlu0 %v1888_v55, %s2394_s14  ;;  %v835_v55 = vld [vmem:[#allocation17] sm:$0x3] }
 0x8e0   :  { %v1206_v10 = vpop.f32.mrf.mxu3 }
 0x8e8   :  { %v1312_v15 = vpop.f32.mrf.mxu3 }
 0x8e9   :  { %v1893_v56 = vpack.i.bf16 %v1312_v15, %v1293_v52  ;;  %v887_v15 = vperm.slane %v835_v55, 0 }
 0x8eb   :  { %1894 = vrot.lane.b32.xlu2 %v1893_v56, %s2395_s1 }
 0x8f0   :  { %v1314_v57 = vpop.f32.mrf.mxu3 }
 0x8f8   :  { %v1420_v58 = vpop.f32.mrf.mxu3 }
 0x900   :  { %v1422_v59 = vpop.f32.mrf.mxu3 }
 0x901   :  { %v1907_v59 = vld [vmem:[#allocation16] ss:$0 sm:$0xff] }
 0x905   :  { %837 = vadd.xlane.f32.xlu0 %v836_v62 }
 0x914   :  { %840 = vadd.xlane.f32.xlu2 %v839_v1 }
 0x91b   :  { %v1401_v2 = vpop.f32.mrf.mxu2 }
 0x91c   :  { %v1898_v3 = vpack.i.bf16 %v1420_v58, %v1401_v2 }
 0x91e   :  { %1899 = vrot.lane.b32.xlu1 %v1898_v3, %s2396_s22 }
 0x923   :  { %v1403_v4 = vpop.f32.mrf.mxu2 }
 0x945   :  { %v1895_v20 = vpop.permute.xlu2 %1894 }
 0x946   :  { %v1897_v33 = vunpack.i.h.bf16 %v1895_v20  ;;  %v1896_v35 = vunpack.i.l.bf16 %v1895_v20 }
 0x94d   :  { %v1890_v11 = vpop.permute.xlu0 %1889 }
 0x94e   :  { %v1892_v24 = vunpack.i.h.bf16 %v1890_v11  ;;  %v1891_v25 = vunpack.i.l.bf16 %v1890_v11 }
 0x950   :  { %v1449_v31 = vsel %vm316_vm1, %v2811_v34, %v1892_v24  ;;  %v1448_v32 = vsel %vm316_vm1, %v2771_v28, %v1891_v25 }
 0x951   :  { %v1450_v39 = vsel %vm789_vm3, %v1448_v32, %v1896_v35  ;;  %v1451_v40 = vsel %vm789_vm3, %v1449_v31, %v1897_v33  ;;  %v1835_v32 = vld [vmem:[%s2902_s15] sm:$0xff]  ;;  %vm1622_vm3 = vcmask 523264  }
 0x978   :  { %v838_v14 = vpop.xlane.xlu0 %837 }
 0x979   :  { %v849_v17 = vmul.f32 %v2829_v27, %v838_v14 }
 0x97b   :  { %v851_v18 = vsub.f32 %v833_v61, %v849_v17  ;;  %v890_v61 = vperm.slane %v835_v55, 1 }
 0x97d   :  { %v853_v19 = vmul.f32 %v851_v18, %v851_v18 }
 0x97f   :  { %v855_v21 = vsel %vm291_vm0, %v853_v19, 0.0 }
 0x980   :  { %856 = vadd.xlane.f32.xlu1 %v855_v21 }
 0x987   :  { %v841_v16 = vpop.xlane.xlu2 %840 }
 0x988   :  { %v850_v22 = vmul.f32 %v2829_v27, %v841_v16 }
 0x98a   :  { %v852_v23 = vsub.f32 %v834_v0, %v850_v22 }
 0x98c   :  { %v854_v29 = vmul.f32 %v852_v23, %v852_v23 }
 0x98e   :  { %v858_v30 = vsel %vm291_vm0, %v854_v29, 0.0  ;;  %v1836_v29 = vld [vmem:[%s2902_s15 + $0x8] sm:$0xff] }
 0x98f   :  { %859 = vadd.xlane.f32.xlu0 %v858_v30  ;;  %1575 = vmatpush.bf16.msrb.mxu1 %v1836_v29 }
 0x990   :  { %v1900_v36 = vpop.permute.xlu1 %1899 }
 0x991   :  { %v1902_v37 = vunpack.i.h.bf16 %v1900_v36  ;;  %v1901_v38 = vunpack.i.l.bf16 %v1900_v36 }
 0x993   :  { %v1453_v41 = vsel %vm792_vm4, %v1451_v40, %v1902_v37  ;;  %v1452_v42 = vsel %vm792_vm4, %v1450_v39, %v1901_v38  ;;  %1576 = vmatpush.bf16.msrb.mxu1 %v1835_v32 }
 0x994   :  { %v1458_v43 = vpack.c.bf16 %v1453_v41, %v1452_v42 }
 0x996   :  { %1798 = vmatmul.msk.bf16.vlgmr.msrb.gmra.mxu0 %vm291_vm0, %v1458_v43 }
 0x9f3   :  { %v857_v34 = vpop.xlane.xlu1 %856 }
 0x9f4   :  { %v861_v28 = vmul.f32 %v857_v34, %v2829_v27 }
 0x9f6   :  { %v863_v44 = vadd.f32 1e-05, %v861_v28 }
 0x9f8   :  { %1976 = vrsqrt.f32 %v863_v44  ;;  %vm871_vm7 = vweird.f32 %v863_v44 }
 0x9fe   :  { %v1977_v45 = vpop.eup %1976 }
 0x9ff   :  { %v866_v46 = vmul.f32 %v1977_v45, %v863_v44  ;;  %vm872_vm6 = vweird.f32 %v1977_v45  ;;  %v1494_v44 = vld [vmem:[#allocation19] sm:$0x3] }
 0xa00   :  { %vm873_vm8 = vmor %vm871_vm7, %vm872_vm6 }
 0xa01   :  { %v867_v47 = vmul.f32 %v1977_v45, %v866_v46 }
 0xa02   :  { %v860_v48 = vpop.xlane.xlu0 %859 }
 0xa03   :  { %v868_v49 = vmul.f32 0.5, %v867_v47  ;;  %v862_v50 = vmul.f32 %v860_v48, %v2829_v27  ;;  %v1539_v48 = vperm.slane %v1494_v44, 0 }
 0xa05   :  { %v869_v51 = vsub.f32 1.5, %v868_v49  ;;  %v864_v52 = vadd.f32 1e-05, %v862_v50 }
 0xa07   :  { %v870_v53 = vmul.f32 %v1977_v45, %v869_v51  ;;  %1978 = vrsqrt.f32 %v864_v52  ;;  %vm881_vm10 = vweird.f32 %v864_v52 }
 0xa09   :  { %v874_v54 = vsel %vm873_vm8, %v1977_v45, %v870_v53 }
 0xa0a   :  { %v885_v10 = vmul.f32 %v874_v54, %v851_v18 }
 0xa0c   :  { %v888_v60 = vmul.f32 %v887_v15, %v885_v10 }
 0xa0d   :  { %v1979_v56 = vpop.eup %1978 }
 0xa0e   :  { %v876_v57 = vmul.f32 %v1979_v56, %v864_v52  ;;  %vm882_vm9 = vweird.f32 %v1979_v56  ;;  %v891_v2 = vadd.f32 %v890_v61, %v888_v60  ;;  %v1542_v52 = vperm.slane %v1494_v44, 1  ;;  %v1837_v60 = vld [vmem:[%s2904_s17] sm:$0xff] }
 0xa0f   :  { %vm883_vm11 = vmor %vm881_vm10, %vm882_vm9 }
 0xa10   :  { %v877_v58 = vmul.f32 %v1979_v56, %v876_v57  ;;  %v1840_v57 = vld [vmem:[%s2904_s17 + $0x18] sm:$0xff] }
 0xa11   :  { %1630 = vmatpush.bf16.msra.mxu2 %v1840_v57 }
 0xa12   :  { %v878_v62 = vmul.f32 0.5, %v877_v58  ;;  %v1839_v58 = vld [vmem:[%s2904_s17 + $0x10] sm:$0xff] }
 0xa13   :  { %v1487_v63 = vpop.f32.mrf.mxu0 }
 0xa14   :  { %v879_v0 = vsub.f32 1.5, %v878_v62  ;;  %v1488_v1 = vadd.f32 %v1907_v59, %v1487_v63  ;;  %v1908_v62 = vld [vmem:[#allocation22] ss:$0 sm:$0xff] }
 0xa15   :  { %1631 = vmatpush.bf16.msra.mxu2 %v1839_v58 }
 0xa16   :  { %v880_v3 = vmul.f32 %v1979_v56, %v879_v0  ;;  %v1492_v4 = vadd.f32 %v1488_v1, %v891_v2 }
 0xa18   :  { %v884_v5 = vsel %vm883_vm11, %v1979_v56, %v880_v3  ;;  %v1495_v26 = vsel %vm291_vm0, %v1492_v4, 0.0 }
 0xa19   :  { %1496 = vadd.xlane.f32.xlu2 %v1495_v26  ;;  %v886_v7 = vmul.f32 %v884_v5, %v852_v23  ;;  %v1909_v5 = vld [vmem:[#allocation23] ss:$0 sm:$0xff] }
 0xa1b   :  { %v1489_v8 = vpop.f32.mrf.mxu0  ;;  %v889_v6 = vmul.f32 %v887_v15, %v886_v7 }
 0xa1c   :  { %v1490_v9 = vadd.f32 %v1907_v59, %v1489_v8  ;;  %v1838_v59 = vld [vmem:[%s2904_s17 + $0x8] sm:$0xff]  ;;  %s2398_s17 = smov [#allocation25]  }
 0xa1d   :  { %v892_v11 = vadd.f32 %v890_v61, %v889_v6  ;;  %1632 = vmatpush.bf16.msra.mxu2 %v1838_v59  ;;  %s1699_s8 = sshll.u32 %s2398_s17, 4  ;;  %s1700_s8 = int_to_ptr.vmem [resolvable:$true] %s1699_s8 }
 0xa1f   :  { %v1493_v12 = vadd.f32 %v1490_v9, %v892_v11 }
 0xa21   :  { %v1498_v13 = vsel %vm291_vm0, %v1493_v12, 0.0  ;;  %1633 = vmatpush.bf16.msra.mxu2 %v1837_v60 }
 0xa22   :  { %1499 = vadd.xlane.f32.xlu0 %v1498_v13 }
 0xa8c   :  { %v1497_v14 = vpop.xlane.xlu2 %1496 }
 0xa8d   :  { %v1501_v17 = vmul.f32 %v1497_v14, %v2829_v27 }
 0xa8f   :  { %v1503_v18 = vsub.f32 %v1492_v4, %v1501_v17 }
 0xa91   :  { %v1505_v19 = vmul.f32 %v1503_v18, %v1503_v18 }
 0xa93   :  { %v1507_v20 = vsel %vm291_vm0, %v1505_v19, 0.0 }
 0xa94   :  { %1508 = vadd.xlane.f32.xlu2 %v1507_v20 }
 0xa95   :  { %v1500_v21 = vpop.xlane.xlu0 %1499 }
 0xa96   :  { %v1502_v16 = vmul.f32 %v1500_v21, %v2829_v27 }
 0xa98   :  { %v1504_v22 = vsub.f32 %v1493_v12, %v1502_v16 }
 0xa9a   :  { %v1506_v23 = vmul.f32 %v1504_v22, %v1504_v22 }
 0xa9c   :  { %v1510_v24 = vsel %vm291_vm0, %v1506_v23, 0.0 }
 0xa9d   :  { %1511 = vadd.xlane.f32.xlu0 %v1510_v24 }
 0xb07   :  { %v1509_v25 = vpop.xlane.xlu2 %1508 }
 0xb08   :  { %v1513_v30 = vmul.f32 %v1509_v25, %v2829_v27 }
 0xb0a   :  { %v1515_v31 = vadd.f32 1e-05, %v1513_v30 }
 0xb0c   :  { %1980 = vrsqrt.f32 %v1515_v31  ;;  %vm1523_vm13 = vweird.f32 %v1515_v31 }
 0xb10   :  { %v1512_v33 = vpop.xlane.xlu0 %1511 }
 0xb11   :  { %v1514_v35 = vmul.f32 %v1512_v33, %v2829_v27 }
 0xb12   :  { %v1981_v36 = vpop.eup %1980 }
 0xb13   :  { %v1518_v37 = vmul.f32 %v1981_v36, %v1515_v31  ;;  %v1516_v38 = vadd.f32 1e-05, %v1514_v35  ;;  %vm1524_vm12 = vweird.f32 %v1981_v36 }
 0xb14   :  { %vm1525_vm14 = vmor %vm1523_vm13, %vm1524_vm12 }
 0xb15   :  { %v1519_v39 = vmul.f32 %v1981_v36, %v1518_v37  ;;  %1982 = vrsqrt.f32 %v1516_v38  ;;  %vm1533_vm1 = vweird.f32 %v1516_v38 }
 0xb17   :  { %v1520_v40 = vmul.f32 0.5, %v1519_v39  ;;  %v1642_v39 = vld [vmem:[#allocation20] sm:$0x3] }
 0xb19   :  { %v1521_v41 = vsub.f32 1.5, %v1520_v40 }
 0xb1b   :  { %v1983_v42 = vpop.eup %1982  ;;  %v1522_v43 = vmul.f32 %v1981_v36, %v1521_v41 }
 0xb1c   :  { %v1528_v34 = vmul.f32 %v1983_v42, %v1516_v38  ;;  %vm1534_vm15 = vweird.f32 %v1983_v42 }
 0xb1d   :  { %v1526_v45 = vsel %vm1525_vm14, %v1981_v36, %v1522_v43  ;;  %vm1535_vm2 = vmor %vm1533_vm1, %vm1534_vm15 }
 0xb1e   :  { %v1529_v28 = vmul.f32 %v1983_v42, %v1528_v34  ;;  %v1537_v49 = vmul.f32 %v1526_v45, %v1503_v18  ;;  %v1687_v34 = vperm.slane %v1642_v39, 0  ;;  %v1690_v45 = vperm.slane %v1642_v39, 1 }
 0xb20   :  { %v1530_v46 = vmul.f32 0.5, %v1529_v28  ;;  %v1540_v53 = vmul.f32 %v1539_v48, %v1537_v49 }
 0xb22   :  { %v1531_v47 = vsub.f32 1.5, %v1530_v46  ;;  %v1543_v10 = vadd.f32 %v1542_v52, %v1540_v53 }
 0xb24   :  { %v1532_v50 = vmul.f32 %v1983_v42, %v1531_v47 }
 0xb26   :  { %v1536_v51 = vsel %vm1535_vm2, %v1983_v42, %v1532_v50 }
 0xb27   :  { %v1538_v54 = vmul.f32 %v1536_v51, %v1504_v22 }
 0xb29   :  { %v1541_v55 = vmul.f32 %v1539_v48, %v1538_v54 }
 0xb2b   :  { %v1544_v15 = vadd.f32 %v1542_v52, %v1541_v55 }
 0xb2d   :  { %v1549_v56 = vpack.c.bf16 %v1544_v15, %v1543_v10 }
 0xb2f   :  { %1807 = vmatmul.msk.bf16.vlgmr.msrb.gmra.mxu1 %vm291_vm0, %v1549_v56 }
 0xbac   :  { %v1578_v61 = vpop.f32.mrf.mxu1 }
 0xbad   :  { %v1579_v63 = vadd.f32 %v1908_v62, %v1578_v61 }
 0xbaf   :  { %v1583_v2 = vmax.f32 %v1579_v63, 0.0 }
 0xbb4   :  { %v1580_v0 = vpop.f32.mrf.mxu1 }
 0xbb5   :  { %v1581_v1 = vadd.f32 %v1908_v62, %v1580_v0 }
 0xbb7   :  { %v1584_v3 = vmax.f32 %v1581_v1, 0.0 }
 0xbb9   :  { %v1593_v4 = vpack.c.bf16 %v1584_v3, %v1583_v2 }
 0xbbb   :  { %1824 = vmatmul.msk.bf16.vlgmr.msra.gmra.mxu2 %vm1622_vm3, %v1593_v4 }
 0xc3e   :  { %v1635_v26 = vpop.f32.mrf.mxu2 }
 0xc3f   :  { %v1636_v7 = vadd.f32 %v1909_v5, %v1635_v26 }
 0xc41   :  { %v1640_v8 = vadd.f32 %v1636_v7, %v1543_v10 }
 0xc43   :  { %v1643_v6 = vsel %vm291_vm0, %v1640_v8, 0.0 }
 0xc44   :  { %1644 = vadd.xlane.f32.xlu2 %v1643_v6 }
 0xc46   :  { %v1637_v9 = vpop.f32.mrf.mxu2 }
 0xc47   :  { %v1638_v11 = vadd.f32 %v1909_v5, %v1637_v9 }
 0xc49   :  { %v1641_v12 = vadd.f32 %v1638_v11, %v1544_v15 }
 0xc4b   :  { %v1646_v13 = vsel %vm291_vm0, %v1641_v12, 0.0 }
 0xc4c   :  { %1647 = vadd.xlane.f32.xlu1 %v1646_v13 }
 0xcb7   :  { %v1645_v14 = vpop.xlane.xlu2 %1644 }
 0xcb8   :  { %v1649_v17 = vmul.f32 %v1645_v14, %v2829_v27 }
 0xcba   :  { %v1651_v18 = vsub.f32 %v1640_v8, %v1649_v17 }
 0xcbc   :  { %v1653_v19 = vmul.f32 %v1651_v18, %v1651_v18 }
 0xcbe   :  { %v1655_v20 = vsel %vm291_vm0, %v1653_v19, 0.0 }
 0xcbf   :  { %v1648_v21 = vpop.xlane.xlu1 %1647  ;;  %1656 = vadd.xlane.f32.xlu0 %v1655_v20 }
 0xcc0   :  { %v1650_v16 = vmul.f32 %v1648_v21, %v2829_v27 }
 0xcc2   :  { %v1652_v22 = vsub.f32 %v1641_v12, %v1650_v16 }
 0xcc4   :  { %v1654_v23 = vmul.f32 %v1652_v22, %v1652_v22 }
 0xcc6   :  { %v1658_v24 = vsel %vm291_vm0, %v1654_v23, 0.0 }
 0xcc7   :  { %1659 = vadd.xlane.f32.xlu2 %v1658_v24 }
 0xd32   :  { %v1657_v25 = vpop.xlane.xlu0 %1656 }
 0xd33   :  { %v1661_v29 = vmul.f32 %v1657_v25, %v2829_v27 }
 0xd35   :  { %v1663_v30 = vadd.f32 1e-05, %v1661_v29 }
 0xd37   :  { %1984 = vrsqrt.f32 %v1663_v30  ;;  %vm1671_vm5 = vweird.f32 %v1663_v30 }
 0xd3a   :  { %v1660_v31 = vpop.xlane.xlu2 %1659 }
 0xd3b   :  { %v1662_v32 = vmul.f32 %v1660_v31, %v2829_v27 }
 0xd3d   :  { %v1985_v33 = vpop.eup %1984  ;;  %v1664_v35 = vadd.f32 1e-05, %v1662_v32 }
 0xd3e   :  { %v1666_v36 = vmul.f32 %v1985_v33, %v1663_v30  ;;  %vm1672_vm4 = vweird.f32 %v1985_v33 }
 0xd3f   :  { %1986 = vrsqrt.f32 %v1664_v35  ;;  %vm1673_vm6 = vmor %vm1671_vm5, %vm1672_vm4  ;;  %vm1681_vm8 = vweird.f32 %v1664_v35 }
 0xd40   :  { %v1667_v37 = vmul.f32 %v1985_v33, %v1666_v36 }
 0xd42   :  { %v1668_v38 = vmul.f32 0.5, %v1667_v37 }
 0xd44   :  { %v1669_v40 = vsub.f32 1.5, %v1668_v38 }
 0xd45   :  { %v1987_v41 = vpop.eup %1986 }
 0xd46   :  { %v1670_v42 = vmul.f32 %v1985_v33, %v1669_v40  ;;  %v1676_v43 = vmul.f32 %v1987_v41, %v1664_v35  ;;  %vm1682_vm7 = vweird.f32 %v1987_v41 }
 0xd47   :  { %vm1683_vm9 = vmor %vm1681_vm8, %vm1682_vm7 }
 0xd48   :  { %v1674_v28 = vsel %vm1673_vm6, %v1985_v33, %v1670_v42  ;;  %v1677_v44 = vmul.f32 %v1987_v41, %v1676_v43 }
 0xd49   :  { %v1685_v46 = vmul.f32 %v1674_v28, %v1651_v18 }
 0xd4a   :  { %v1678_v27 = vmul.f32 0.5, %v1677_v44 }
 0xd4b   :  { %v1688_v47 = vmul.f32 %v1687_v34, %v1685_v46 }
 0xd4c   :  { %v1679_v48 = vsub.f32 1.5, %v1678_v27 }
 0xd4d   :  { %v1691_v49 = vadd.f32 %v1690_v45, %v1688_v47 }
 0xd4e   :  { %v1680_v50 = vmul.f32 %v1987_v41, %v1679_v48 }
 0xd4f   :  { %1693 = vst.msk [vmem:[#allocation25] sm:$0xff] %vm291_vm0, %v1691_v49 }
 0xd50   :  { %v1684_v51 = vsel %vm1683_vm9, %v1987_v41, %v1680_v50 }
 0xd51   :  { %v1686_v52 = vmul.f32 %v1684_v51, %v1652_v22 }
 0xd53   :  { %v1689_v53 = vmul.f32 %v1687_v34, %v1686_v52 }
 0xd55   :  { %v1692_v54 = vadd.f32 %v1690_v45, %v1689_v53 }
 0xd57   :  { %1694 = vst.msk [vmem:[#allocation25 + $0x8] sm:$0xff] %vm291_vm0, %v1692_v54 }
 0xd58   :  { %1707 = dma.vmem_to_hbm [thread:$0]  %s1700_s8, 256, %s1702_s11, [#allocation4], %s2399_s2, %s2399_s2, %s2394_s14  }
 0xd59   :  { %2366 = dma.done.wait [#allocation4], 256  }
 0xd5a   :  { %2367 = vsyncadd [#allocation4], 4294967040 }
 0xd5b   :  { %1712 = vsyncpa [#allocation3], 1 }
 0xd5c   :  { %1713 = vsyncpa [#allocation6], 1 }
 0xd5d   :  { %1714 = vsyncpa [#allocation9], 1 }
 0xd5e   :  { %1715 = vsyncpa [#allocation12], 1 }
 0xd5f   :  { %1716 = vsyncpa [#allocation15], 1 }
 0xd60   :  { %1717 = vsyncpa [#allocation18], 1 }
 0xd61   :  { %1718 = vsyncpa [#allocation21], 1 }
 0xd62   :  { %1719 = vsyncpa [#allocation24], 1 }
 0xd63   :  { %1720 = vsyncpa [#allocation4], 1 }

</bundles_post_ra>
